<compile_context>
chip_gen: v7x
topology: tpu7x:2x2x1
jax: 0.10.0
libtpu: 0.0.40
codegen_flags: <defaults>
</compile_context>

<pallas_src>
import functools

import jax
import jax.numpy as jnp
from jax import lax
from jax.experimental import pallas as pl
from jax.experimental.pallas import tpu as pltpu

BN_EPS = 1e-5


# ------------------------------ fused kernel --------------------------------

def _fused_ir_kernel(*refs, stride, dilation, expand, use_res, to, wo,
                     h_img, w_img):
    """One (batch, row-strip) grid step: expand 1x1 -> dw 3x3 -> project 1x1."""
    if expand:
        (x_ref, w_exp_ref, b_exp_ref, w_dw_ref, b_dw_ref,
         w_proj_ref, b_proj_ref, o_ref, h_ref, y_ref) = refs
    else:
        (x_ref, w_dw_ref, b_dw_ref, w_proj_ref, b_proj_ref,
         o_ref, h_ref, y_ref) = refs

    f32 = jnp.float32
    d = dilation
    tin, _, wh, ch = h_ref.shape          # wh % 8 == 0, ch % 128 == 0 (if expand)
    wo8 = y_ref.shape[0] // to            # wo rounded up to a multiple of 8
    cout = o_ref.shape[-1]
    si = pl.program_id(1)
    # first padded input row needed by this strip of output rows
    r0 = pl.multiple_of(si * (to * stride), to * stride)

    # ---- stage 1: 1x1 expand as ONE strip-batched MXU matmul (+BN+ReLU6) ----
    x_strip = x_ref[0, pl.ds(r0, tin)]                 # (tin, stride, wh, cin)
    if expand:
        cin = x_strip.shape[-1]
        hr = jnp.dot(x_strip.reshape(tin * stride * wh, cin), w_exp_ref[...],
                     preferred_element_type=f32)       # (M, ch), f32 acc
        hr = jnp.clip(hr + b_exp_ref[...], 0.0, 6.0)
        hr = hr.reshape(tin, stride, wh, ch)
        # zero the spatial halo of the hidden activation (padding is applied to
        # the *hidden* tensor by the 3x3 conv, and relu6(bias) != 0).
        mshape = (tin, stride, wh, 1)
        ri = r0 + lax.broadcasted_iota(jnp.int32, mshape, 0)
        ci = (stride * lax.broadcasted_iota(jnp.int32, mshape, 2)
              + lax.broadcasted_iota(jnp.int32, mshape, 1))
        ok = (ri >= d) & (ri < d + h_img) & (ci >= d) & (ci < d + w_img)
        h_ref[...] = jnp.where(ok, hr, 0.0).astype(h_ref.dtype)
    else:
        # expand_ratio == 1: depthwise input is the (host zero-padded) input.
        h_ref[...] = x_strip.astype(h_ref.dtype)

    # ---- stage 2: depthwise 3x3 + BN + ReLU6, per output row (vreg acc) -----
    w_dw = w_dw_ref[...].astype(f32)                   # hoisted (3, 3, ch)
    b_dw = b_dw_ref[...]                               # (1, ch) f32
    for o in range(to):
        acc = jnp.zeros((wo, ch), f32)
        for kh in range(3):
            row = o * stride + kh * d                  # static
            for kw in range(3):
                off = kw * d
                pw, j0 = off % stride, off // stride   # static
                tap = h_ref[row, pw, j0:j0 + wo, :].astype(f32)
                acc = acc + tap * w_dw[kh, kw][None, :]
        y_row = jnp.clip(acc + b_dw, 0.0, 6.0)
        y_ref[o * wo8:o * wo8 + wo, :] = y_row.astype(y_ref.dtype)
        # columns [wo, wo8) of this row block stay unwritten; they feed only
        # matmul rows that are sliced away before the store below.

    # ---- stage 3: 1x1 projection as ONE matmul (+BN, +residual), one store ---
    out = jnp.dot(y_ref[...], w_proj_ref[...], preferred_element_type=f32)
    out = (out + b_proj_ref[...]).reshape(to, wo8, cout)[:, :wo, :]
    if use_res:                                        # stride == 1, cin == cout
        out = out + x_ref[0, pl.ds(r0 + d, to), 0, d:d + wo, :].astype(f32)
    o_ref[0] = out.astype(o_ref.dtype)


# ------------------------------- wrappers ------------------------------------

def _round_up(x, m):
    return -(-x // m) * m


def _pick_strip_rows(ho, wo8, wh8, stride, dilation, ch_pad, itemsize,
                     budget_bytes, max_rows=8):
    """Largest divisor of `ho` (<= max_rows) whose scratch fits the budget."""
    best = 1
    for t in range(1, min(ho, max_rows) + 1):
        if ho % t:
            continue
        tin = t * stride + 2 * dilation
        scratch = (tin * stride * wh8 + t * wo8) * ch_pad * itemsize
        if t == 1 or scratch <= budget_bytes:
            best = t
    return best


def inverted_residual_forward_nhwc(x_nhwc, params, *, in_channels, out_channels,
                                   stride, expand_ratio, dilation=1,
                                   max_strip_rows=8):
    """Fused InvertedResidual forward on an NHWC tensor (preferred entry point:
    chaining blocks in NHWC avoids per-layer layout transposes)."""
    assert stride in (1, 2)
    assert dilation >= 1
    n, h, w, cin = x_nhwc.shape
    assert cin == in_channels
    hidden = int(round(in_channels * expand_ratio))
    expand = expand_ratio != 1
    use_res = (stride == 1 and in_channels == out_channels)
    d = dilation
    f32 = jnp.float32
    dtype = x_nhwc.dtype
    itemsize = jnp.dtype(dtype).itemsize

    ho = (h - 1) // stride + 1
    wo = (w - 1) // stride + 1
    hp = stride * ho + 2 * d                     # padded row extent
    wh8 = _round_up((stride * wo + 2 * d) // stride, 8)   # de-interleaved width
    wp8 = stride * wh8                            # padded col extent (8-aligned)
    wo8 = _round_up(wo, 8)

    # Pad hidden channels to the 128-lane width (zero weights -> exact zeros).
    ch_pad = _round_up(hidden, 128) if expand else hidden
    pad_c = ch_pad - hidden

    # VMEM budget / strip size (v7x has only 64 MiB physical VMEM).
    try:
        vmem_cap = int(pltpu.get_tpu_info().vmem_capacity_bytes)
    except Exception:
        vmem_cap = 64 * 1024 * 1024
    vmem_limit = min(vmem_cap * 3 // 4, 96 * 1024 * 1024)
    input_resident = 2 * hp * stride * wh8 * cin * itemsize   # double-buffered
    budget = max(2 * 1024 * 1024, (vmem_limit - input_resident) // 3)
    to = _pick_strip_rows(ho, wo8, wh8, stride, d, ch_pad, itemsize, budget,
                          max_rows=max_strip_rows)
    n_strips = ho // to
    tin = to * stride + 2 * d                     # input rows (incl. halo)/strip

    # Zero-pad the (small, C_in-channel) input once; the large hidden activation
    # never touches HBM.  De-interleave W by `stride` so all in-kernel depthwise
    # taps are plain slices:  xd[n, r, p, j, c] = xp[n, r, stride*j + p, c].
    # TODO(synk): when chaining blocks, have the producing kernel emit this
    # padded / de-interleaved layout directly to avoid the extra HBM pass.
    xp = jnp.pad(x_nhwc, ((0, 0), (d, hp - d - h), (d, wp8 - d - w), (0, 0)))
    xd = xp.reshape(n, hp, wh8, stride, cin).transpose(0, 1, 3, 2, 4)

    # Fold the BatchNorm scale into the conv weights (host side, free); pad the
    # hidden dimension with zeros.
    def fold(wgt, scale):
        return (wgt * scale).astype(dtype)

    w_dw = fold(params["w_dw"], params["scale_dw"])
    b_dw = params["bias_dw"].astype(f32)
    w_proj = fold(params["w_proj"], params["scale_proj"][None, :])
    b_proj = params["bias_proj"].reshape(1, out_channels).astype(f32)
    if pad_c:
        w_dw = jnp.pad(w_dw, ((0, 0), (0, 0), (0, pad_c)))
        b_dw = jnp.pad(b_dw, (0, pad_c))
        w_proj = jnp.pad(w_proj, ((0, pad_c), (0, 0)))
    b_dw = b_dw.reshape(1, ch_pad)

    args = [xd]
    in_specs = [pl.BlockSpec((1, hp, stride, wh8, cin),
                             lambda ni, si: (ni, 0, 0, 0, 0))]
    if expand:
        w_exp = fold(params["w_expand"], params["scale_expand"][None, :])
        b_exp = params["bias_expand"].astype(f32)
        if pad_c:
            w_exp = jnp.pad(w_exp, ((0, 0), (0, pad_c)))
            b_exp = jnp.pad(b_exp, (0, pad_c))
        b_exp = b_exp.reshape(1, ch_pad)
        args += [w_exp, b_exp]
        in_specs += [pl.BlockSpec((in_channels, ch_pad), lambda ni, si: (0, 0)),
                     pl.BlockSpec((1, ch_pad), lambda ni, si: (0, 0))]
    args += [w_dw, b_dw, w_proj, b_proj]
    in_specs += [pl.BlockSpec((3, 3, ch_pad), lambda ni, si: (0, 0, 0)),
                 pl.BlockSpec((1, ch_pad), lambda ni, si: (0, 0)),
                 pl.BlockSpec((ch_pad, out_channels), lambda ni, si: (0, 0)),
                 pl.BlockSpec((1, out_channels), lambda ni, si: (0, 0))]

    kernel = functools.partial(
        _fused_ir_kernel, stride=stride, dilation=d, expand=expand,
        use_res=use_res, to=to, wo=wo, h_img=h, w_img=w)

    return pl.pallas_call(
        kernel,
        out_shape=jax.ShapeDtypeStruct((n, ho, wo, out_channels), dtype),
        grid=(n, n_strips),
        in_specs=in_specs,
        out_specs=pl.BlockSpec((1, to, wo, out_channels),
                               lambda ni, si: (ni, si, 0, 0)),
        scratch_shapes=[pltpu.VMEM((tin, stride, wh8, ch_pad), dtype),
                        pltpu.VMEM((to * wo8, ch_pad), dtype)],
        compiler_params=pltpu.CompilerParams(
            dimension_semantics=("parallel", "parallel"),
            vmem_limit_bytes=int(vmem_limit)),
    )(*args)


def inverted_residual_forward(x_nchw, params, **kwargs):
    """NCHW wrapper matching the PyTorch module interface."""
    x = jnp.transpose(x_nchw, (0, 2, 3, 1))
    y = inverted_residual_forward_nhwc(x, params, **kwargs)
    return jnp.transpose(y, (0, 3, 1, 2))


# -------------------------- params & pure-JAX reference ----------------------

def _fold_bn(gamma, beta, mean, var):
    scale = gamma / jnp.sqrt(var + BN_EPS)
    return scale, beta - mean * scale


def init_params(key, in_channels, out_channels, expand_ratio):
    hidden = int(round(in_channels * expand_ratio))
    ks = jax.random.split(key, 6)

    def bn_params(k, c):
        k1, k2, k3, k4 = jax.random.split(k, 4)
        gamma = 1.0 + 0.1 * jax.random.normal(k1, (c,), jnp.float32)
        beta = 0.1 * jax.random.normal(k2, (c,), jnp.float32)
        mean = 0.1 * jax.random.normal(k3, (c,), jnp.float32)
        var = jax.random.uniform(k4, (c,), jnp.float32, 0.5, 1.5)
        return _fold_bn(gamma, beta, mean, var)

    p = {}
    if expand_ratio != 1:
        p["w_expand"] = 0.3 * jax.random.normal(
            ks[0], (in_channels, hidden), jnp.float32)
        p["scale_expand"], p["bias_expand"] = bn_params(ks[1], hidden)
    p["w_dw"] = 0.3 * jax.random.normal(ks[2], (3, 3, hidden), jnp.float32)
    p["scale_dw"], p["bias_dw"] = bn_params(ks[3], hidden)
    p["w_proj"] = 0.3 * jax.random.normal(
        ks[4], (hidden, out_channels), jnp.float32)
    p["scale_proj"], p["bias_proj"] = bn_params(ks[5], out_channels)
    return p


def ref_forward(x_nchw, params, *, in_channels, out_channels, stride,
                expand_ratio, dilation=1):
    """Pure-JAX NCHW reference matching the PyTorch module (eval-mode BN)."""
    hidden = int(round(in_channels * expand_ratio))
    use_res = (stride == 1 and in_channels == out_channels)

    def conv(x, w, s, p_, dd, groups):
        return lax.conv_general_dilated(
            x, w, window_strides=(s, s), padding=((p_, p_), (p_, p_)),
            rhs_dilation=(dd, dd), feature_group_count=groups,
            dimension_numbers=("NCHW", "OIHW", "NCHW"))

    def bn(x, scale, bias):
        return x * scale[None, :, None, None] + bias[None, :, None, None]

    h = x_nchw
    if expand_ratio != 1:
        w1 = jnp.transpose(params["w_expand"], (1, 0))[:, :, None, None]
        h = jnp.clip(bn(conv(h, w1, 1, 0, 1, 1),
                        params["scale_expand"], params["bias_expand"]), 0.0, 6.0)
    w2 = jnp.transpose(params["w_dw"], (2, 0, 1))[:, None, :, :]
    h = jnp.clip(bn(conv(h, w2, stride, dilation, dilation, hidden),
                    params["scale_dw"], params["bias_dw"]), 0.0, 6.0)
    w3 = jnp.transpose(params["w_proj"], (1, 0))[:, :, None, None]
    h = bn(conv(h, w3, 1, 0, 1, 1), params["scale_proj"], params["bias_proj"])
    return x_nchw + h if use_res else h


# ---------------------------------- main --------------------------------------

if __name__ == "__main__":
    key = jax.random.PRNGKey(0)
    cases = [
        # covers residual path, stride-2 multi-phase, expand_ratio==1, odd sizes
        dict(shape=(2, 4, 16, 16), in_channels=4, out_channels=4, stride=1, expand_ratio=6),
        dict(shape=(2, 4, 32, 16), in_channels=4, out_channels=8, stride=2, expand_ratio=6),
        dict(shape=(2, 6, 15, 13), in_channels=6, out_channels=6, stride=1, expand_ratio=1),
        dict(shape=(2, 5, 11, 9),  in_channels=5, out_channels=7, stride=2, expand_ratio=4),
    ]
    for idx, cfg in enumerate(cases):
        kx, kp, key = jax.random.split(key, 3)
        x = jax.random.normal(kx, cfg["shape"], jnp.float32)
        params = init_params(kp, cfg["in_channels"], cfg["out_channels"],
                             cfg["expand_ratio"])
        fwd = jax.jit(functools.partial(
            inverted_residual_forward,
            in_channels=cfg["in_channels"], out_channels=cfg["out_channels"],
            stride=cfg["stride"], expand_ratio=cfg["expand_ratio"]))
        out = jax.block_until_ready(fwd(x, params))
        ref = ref_forward(x, params, in_channels=cfg["in_channels"],
                          out_channels=cfg["out_channels"], stride=cfg["stride"],
                          expand_ratio=cfg["expand_ratio"])
        assert out.shape == ref.shape, (idx, out.shape, ref.shape)
        err = float(jnp.max(jnp.abs(out - ref)))
        assert jnp.allclose(out, ref, rtol=1e-4, atol=1e-4), \
            f"case {idx}: max abs err {err}"
    print("KERNEL_OK")
</pallas_src>

<mosaic_0001>
module attributes {stable_mosaic.version = 11 : i64} {
  func.func @_fused_ir_kernel(%arg0: i32, %arg1: i32, %arg2: memref<1x18x1x24x4xf32, #tpu.memory_space<vmem>>, %arg3: memref<4x128xf32, #tpu.memory_space<vmem>>, %arg4: memref<1x128xf32, #tpu.memory_space<vmem>>, %arg5: memref<3x3x128xf32, #tpu.memory_space<vmem>>, %arg6: memref<1x128xf32, #tpu.memory_space<vmem>>, %arg7: memref<128x4xf32, #tpu.memory_space<vmem>>, %arg8: memref<1x4xf32, #tpu.memory_space<vmem>>, %arg9: memref<1x8x16x4xf32, #tpu.memory_space<vmem>>, %arg10: memref<10x1x24x128xf32, #tpu.memory_space<vmem>>, %arg11: memref<128x128xf32, #tpu.memory_space<vmem>>) attributes {dimension_semantics = [#tpu.dimension_semantics<parallel>, #tpu.dimension_semantics<parallel>], iteration_bounds = array<i64: 2, 2>, scalar_prefetch = 0 : i64, scratch_operands = 2 : i64, tpu.core_type = #tpu.core_type<tc>, window_params = [{transform_indices = @transform_0, window_bounds = array<i64: 1, 18, 1, 24, 4>}, {pipeline_mode = #tpu.pipeline_mode<synchronous>, transform_indices = @transform_1, window_bounds = array<i64: 4, 128>}, {pipeline_mode = #tpu.pipeline_mode<synchronous>, transform_indices = @transform_2, window_bounds = array<i64: 1, 128>}, {pipeline_mode = #tpu.pipeline_mode<synchronous>, transform_indices = @transform_3, window_bounds = array<i64: 3, 3, 128>}, {pipeline_mode = #tpu.pipeline_mode<synchronous>, transform_indices = @transform_4, window_bounds = array<i64: 1, 128>}, {pipeline_mode = #tpu.pipeline_mode<synchronous>, transform_indices = @transform_5, window_bounds = array<i64: 128, 4>}, {pipeline_mode = #tpu.pipeline_mode<synchronous>, transform_indices = @transform_6, window_bounds = array<i64: 1, 4>}, {transform_indices = @transform_7, window_bounds = array<i64: 1, 8, 16, 4>}]} {
    %c8_i32 = arith.constant 8 : i32
    %0 = arith.muli %arg1, %c8_i32 : i32
    %1 = tpu.assume_multiple %0, 8 : i32
    %c0 = arith.constant 0 : index
    %2 = arith.index_cast %1 : i32 to index
    %c0_0 = arith.constant 0 : index
    %c0_1 = arith.constant 0 : index
    %c0_2 = arith.constant 0 : index
    %3 = vector.load %arg2[%c0, %2, %c0_0, %c0_1, %c0_2] : memref<1x18x1x24x4xf32, #tpu.memory_space<vmem>>, vector<1x10x1x24x4xf32>
    %4 = vector.shape_cast %3 : vector<1x10x1x24x4xf32> to vector<10x1x24x4xf32>
    %5 = vector.shape_cast %4 : vector<10x1x24x4xf32> to vector<240x4xf32>
    %c0_3 = arith.constant 0 : index
    %c0_4 = arith.constant 0 : index
    %6 = vector.load %arg3[%c0_3, %c0_4] : memref<4x128xf32, #tpu.memory_space<vmem>>, vector<4x128xf32>
    %cst = arith.constant dense<0.000000e+00> : vector<240x128xf32>
    %7 = tpu.matmul %5, %6, %cst {dimension_numbers = #tpu.dot_dimension_numbers<[1], [0], [0], [1], [0, 0, 1, 1], [], []>} : vector<240x4xf32>, vector<4x128xf32>, vector<240x128xf32> -> vector<240x128xf32>
    %c0_5 = arith.constant 0 : index
    %c0_6 = arith.constant 0 : index
    %8 = vector.load %arg4[%c0_5, %c0_6] : memref<1x128xf32, #tpu.memory_space<vmem>>, vector<1x128xf32>
    %9 = vector.broadcast %8 : vector<1x128xf32> to vector<240x128xf32>
    %10 = arith.addf %7, %9 : vector<240x128xf32>
    %cst_7 = arith.constant 0.000000e+00 : f32
    %cst_8 = arith.constant 6.000000e+00 : f32
    %11 = vector.broadcast %cst_7 : f32 to vector<240x128xf32>
    %12 = arith.maximumf %11, %10 : vector<240x128xf32>
    %13 = vector.broadcast %cst_8 : f32 to vector<240x128xf32>
    %14 = arith.minimumf %13, %12 : vector<240x128xf32>
    %15 = vector.shape_cast %14 : vector<240x128xf32> to vector<10x1x24x128xf32>
    %16 = tpu.iota {dimensions = array<i32: 0>} : vector<10x1x24x1xi32>
    %17 = vector.broadcast %1 : i32 to vector<10x1x24x1xi32>
    %18 = arith.addi %17, %16 : vector<10x1x24x1xi32>
    %19 = tpu.iota {dimensions = array<i32: 2>} : vector<10x1x24x1xi32>
    %c1_i32 = arith.constant 1 : i32
    %20 = vector.broadcast %c1_i32 : i32 to vector<10x1x24x1xi32>
    %21 = arith.muli %20, %19 : vector<10x1x24x1xi32>
    %22 = tpu.iota {dimensions = array<i32: 1>} : vector<10x1x24x1xi32>
    %23 = arith.addi %21, %22 : vector<10x1x24x1xi32>
    %c1_i32_9 = arith.constant 1 : i32
    %24 = vector.broadcast %c1_i32_9 : i32 to vector<10x1x24x1xi32>
    %25 = arith.cmpi sge, %18, %24 : vector<10x1x24x1xi32>
    %c17_i32 = arith.constant 17 : i32
    %26 = vector.broadcast %c17_i32 : i32 to vector<10x1x24x1xi32>
    %27 = arith.cmpi slt, %18, %26 : vector<10x1x24x1xi32>
    %28 = arith.andi %25, %27 : vector<10x1x24x1xi1>
    %c1_i32_10 = arith.constant 1 : i32
    %29 = vector.broadcast %c1_i32_10 : i32 to vector<10x1x24x1xi32>
    %30 = arith.cmpi sge, %23, %29 : vector<10x1x24x1xi32>
    %31 = arith.andi %28, %30 : vector<10x1x24x1xi1>
    %c17_i32_11 = arith.constant 17 : i32
    %32 = vector.broadcast %c17_i32_11 : i32 to vector<10x1x24x1xi32>
    %33 = arith.cmpi slt, %23, %32 : vector<10x1x24x1xi32>
    %34 = arith.andi %31, %33 : vector<10x1x24x1xi1>
    %cst_12 = arith.constant 0.000000e+00 : f32
    %35 = vector.shape_cast %34 : vector<10x1x24x1xi1> to vector<10x1x24x1xi1>
    %36 = vector.broadcast %35 : vector<10x1x24x1xi1> to vector<10x1x24x128xi1>
    %37 = vector.broadcast %cst_12 : f32 to vector<10x1x24x128xf32>
    %38 = arith.select %36, %15, %37 : vector<10x1x24x128xi1>, vector<10x1x24x128xf32>
    %c0_13 = arith.constant 0 : index
    %c0_14 = arith.constant 0 : index
    %c0_15 = arith.constant 0 : index
    %c0_16 = arith.constant 0 : index
    %39 = vector.load %arg10[%c0_13, %c0_14, %c0_15, %c0_16] : memref<10x1x24x128xf32, #tpu.memory_space<vmem>>, vector<10x1x24x128xf32>
    tpu.vector_store %arg10[%c0_13, %c0_14, %c0_15, %c0_16], %38 {strides = array<i32>} : memref<10x1x24x128xf32, #tpu.memory_space<vmem>>, vector<10x1x24x128xf32>,
    %c0_17 = arith.constant 0 : index
    %c0_18 = arith.constant 0 : index
    %c0_19 = arith.constant 0 : index
    %40 = vector.load %arg5[%c0_17, %c0_18, %c0_19] : memref<3x3x128xf32, #tpu.memory_space<vmem>>, vector<3x3x128xf32>
    %c0_20 = arith.constant 0 : index
    %c0_21 = arith.constant 0 : index
    %41 = vector.load %arg6[%c0_20, %c0_21] : memref<1x128xf32, #tpu.memory_space<vmem>>, vector<1x128xf32>
    %cst_22 = arith.constant 0.000000e+00 : f32
    %42 = vector.broadcast %cst_22 : f32 to vector<16x128xf32>
    %c0_23 = arith.constant 0 : index
    %c0_24 = arith.constant 0 : index
    %c0_25 = arith.constant 0 : index
    %c0_26 = arith.constant 0 : index
    %43 = vector.load %arg10[%c0_23, %c0_24, %c0_25, %c0_26] : memref<10x1x24x128xf32, #tpu.memory_space<vmem>>, vector<1x1x16x128xf32>
    %44 = vector.shape_cast %43 : vector<1x1x16x128xf32> to vector<16x128xf32>
    %45 = vector.extract_strided_slice %40 {offsets = [0, 0, 0], sizes = [1, 1, 128], strides = [1, 1, 1]} : vector<3x3x128xf32> to vector<1x1x128xf32>
    %46 = vector.shape_cast %45 : vector<1x1x128xf32> to vector<128xf32>
    %47 = vector.shape_cast %46 : vector<128xf32> to vector<1x128xf32>
    %48 = vector.broadcast %47 : vector<1x128xf32> to vector<16x128xf32>
    %49 = arith.mulf %44, %48 : vector<16x128xf32>
    %50 = arith.addf %42, %49 : vector<16x128xf32>
    %c0_27 = arith.constant 0 : index
    %c0_28 = arith.constant 0 : index
    %c1 = arith.constant 1 : index
    %c0_29 = arith.constant 0 : index
    %51 = vector.load %arg10[%c0_27, %c0_28, %c1, %c0_29] : memref<10x1x24x128xf32, #tpu.memory_space<vmem>>, vector<1x1x16x128xf32>
    %52 = vector.shape_cast %51 : vector<1x1x16x128xf32> to vector<16x128xf32>
    %53 = vector.extract_strided_slice %40 {offsets = [0, 1, 0], sizes = [1, 1, 128], strides = [1, 1, 1]} : vector<3x3x128xf32> to vector<1x1x128xf32>
    %54 = vector.shape_cast %53 : vector<1x1x128xf32> to vector<128xf32>
    %55 = vector.shape_cast %54 : vector<128xf32> to vector<1x128xf32>
    %56 = vector.broadcast %55 : vector<1x128xf32> to vector<16x128xf32>
    %57 = arith.mulf %52, %56 : vector<16x128xf32>
    %58 = arith.addf %50, %57 : vector<16x128xf32>
    %c0_30 = arith.constant 0 : index
    %c0_31 = arith.constant 0 : index
    %c2 = arith.constant 2 : index
    %c0_32 = arith.constant 0 : index
    %59 = vector.load %arg10[%c0_30, %c0_31, %c2, %c0_32] : memref<10x1x24x128xf32, #tpu.memory_space<vmem>>, vector<1x1x16x128xf32>
    %60 = vector.shape_cast %59 : vector<1x1x16x128xf32> to vector<16x128xf32>
    %61 = vector.extract_strided_slice %40 {offsets = [0, 2, 0], sizes = [1, 1, 128], strides = [1, 1, 1]} : vector<3x3x128xf32> to vector<1x1x128xf32>
    %62 = vector.shape_cast %61 : vector<1x1x128xf32> to vector<128xf32>
    %63 = vector.shape_cast %62 : vector<128xf32> to vector<1x128xf32>
    %64 = vector.broadcast %63 : vector<1x128xf32> to vector<16x128xf32>
    %65 = arith.mulf %60, %64 : vector<16x128xf32>
    %66 = arith.addf %58, %65 : vector<16x128xf32>
    %c1_33 = arith.constant 1 : index
    %c0_34 = arith.constant 0 : index
    %c0_35 = arith.constant 0 : index
    %c0_36 = arith.constant 0 : index
    %67 = vector.load %arg10[%c1_33, %c0_34, %c0_35, %c0_36] : memref<10x1x24x128xf32, #tpu.memory_space<vmem>>, vector<1x1x16x128xf32>
    %68 = vector.shape_cast %67 : vector<1x1x16x128xf32> to vector<16x128xf32>
    %69 = vector.extract_strided_slice %40 {offsets = [1, 0, 0], sizes = [1, 1, 128], strides = [1, 1, 1]} : vector<3x3x128xf32> to vector<1x1x128xf32>
    %70 = vector.shape_cast %69 : vector<1x1x128xf32> to vector<128xf32>
    %71 = vector.shape_cast %70 : vector<128xf32> to vector<1x128xf32>
    %72 = vector.broadcast %71 : vector<1x128xf32> to vector<16x128xf32>
    %73 = arith.mulf %68, %72 : vector<16x128xf32>
    %74 = arith.addf %66, %73 : vector<16x128xf32>
    %c1_37 = arith.constant 1 : index
    %c0_38 = arith.constant 0 : index
    %c1_39 = arith.constant 1 : index
    %c0_40 = arith.constant 0 : index
    %75 = vector.load %arg10[%c1_37, %c0_38, %c1_39, %c0_40] : memref<10x1x24x128xf32, #tpu.memory_space<vmem>>, vector<1x1x16x128xf32>
    %76 = vector.shape_cast %75 : vector<1x1x16x128xf32> to vector<16x128xf32>
    %77 = vector.extract_strided_slice %40 {offsets = [1, 1, 0], sizes = [1, 1, 128], strides = [1, 1, 1]} : vector<3x3x128xf32> to vector<1x1x128xf32>
    %78 = vector.shape_cast %77 : vector<1x1x128xf32> to vector<128xf32>
    %79 = vector.shape_cast %78 : vector<128xf32> to vector<1x128xf32>
    %80 = vector.broadcast %79 : vector<1x128xf32> to vector<16x128xf32>
    %81 = arith.mulf %76, %80 : vector<16x128xf32>
    %82 = arith.addf %74, %81 : vector<16x128xf32>
    %c1_41 = arith.constant 1 : index
    %c0_42 = arith.constant 0 : index
    %c2_43 = arith.constant 2 : index
    %c0_44 = arith.constant 0 : index
    %83 = vector.load %arg10[%c1_41, %c0_42, %c2_43, %c0_44] : memref<10x1x24x128xf32, #tpu.memory_space<vmem>>, vector<1x1x16x128xf32>
    %84 = vector.shape_cast %83 : vector<1x1x16x128xf32> to vector<16x128xf32>
    %85 = vector.extract_strided_slice %40 {offsets = [1, 2, 0], sizes = [1, 1, 128], strides = [1, 1, 1]} : vector<3x3x128xf32> to vector<1x1x128xf32>
    %86 = vector.shape_cast %85 : vector<1x1x128xf32> to vector<128xf32>
    %87 = vector.shape_cast %86 : vector<128xf32> to vector<1x128xf32>
    %88 = vector.broadcast %87 : vector<1x128xf32> to vector<16x128xf32>
    %89 = arith.mulf %84, %88 : vector<16x128xf32>
    %90 = arith.addf %82, %89 : vector<16x128xf32>
    %c2_45 = arith.constant 2 : index
    %c0_46 = arith.constant 0 : index
    %c0_47 = arith.constant 0 : index
    %c0_48 = arith.constant 0 : index
    %91 = vector.load %arg10[%c2_45, %c0_46, %c0_47, %c0_48] : memref<10x1x24x128xf32, #tpu.memory_space<vmem>>, vector<1x1x16x128xf32>
    %92 = vector.shape_cast %91 : vector<1x1x16x128xf32> to vector<16x128xf32>
    %93 = vector.extract_strided_slice %40 {offsets = [2, 0, 0], sizes = [1, 1, 128], strides = [1, 1, 1]} : vector<3x3x128xf32> to vector<1x1x128xf32>
    %94 = vector.shape_cast %93 : vector<1x1x128xf32> to vector<128xf32>
    %95 = vector.shape_cast %94 : vector<128xf32> to vector<1x128xf32>
    %96 = vector.broadcast %95 : vector<1x128xf32> to vector<16x128xf32>
    %97 = arith.mulf %92, %96 : vector<16x128xf32>
    %98 = arith.addf %90, %97 : vector<16x128xf32>
    %c2_49 = arith.constant 2 : index
    %c0_50 = arith.constant 0 : index
    %c1_51 = arith.constant 1 : index
    %c0_52 = arith.constant 0 : index
    %99 = vector.load %arg10[%c2_49, %c0_50, %c1_51, %c0_52] : memref<10x1x24x128xf32, #tpu.memory_space<vmem>>, vector<1x1x16x128xf32>
    %100 = vector.shape_cast %99 : vector<1x1x16x128xf32> to vector<16x128xf32>
    %101 = vector.extract_strided_slice %40 {offsets = [2, 1, 0], sizes = [1, 1, 128], strides = [1, 1, 1]} : vector<3x3x128xf32> to vector<1x1x128xf32>
    %102 = vector.shape_cast %101 : vector<1x1x128xf32> to vector<128xf32>
    %103 = vector.shape_cast %102 : vector<128xf32> to vector<1x128xf32>
    %104 = vector.broadcast %103 : vector<1x128xf32> to vector<16x128xf32>
    %105 = arith.mulf %100, %104 : vector<16x128xf32>
    %106 = arith.addf %98, %105 : vector<16x128xf32>
    %c2_53 = arith.constant 2 : index
    %c0_54 = arith.constant 0 : index
    %c2_55 = arith.constant 2 : index
    %c0_56 = arith.constant 0 : index
    %107 = vector.load %arg10[%c2_53, %c0_54, %c2_55, %c0_56] : memref<10x1x24x128xf32, #tpu.memory_space<vmem>>, vector<1x1x16x128xf32>
    %108 = vector.shape_cast %107 : vector<1x1x16x128xf32> to vector<16x128xf32>
    %109 = vector.extract_strided_slice %40 {offsets = [2, 2, 0], sizes = [1, 1, 128], strides = [1, 1, 1]} : vector<3x3x128xf32> to vector<1x1x128xf32>
    %110 = vector.shape_cast %109 : vector<1x1x128xf32> to vector<128xf32>
    %111 = vector.shape_cast %110 : vector<128xf32> to vector<1x128xf32>
    %112 = vector.broadcast %111 : vector<1x128xf32> to vector<16x128xf32>
    %113 = arith.mulf %108, %112 : vector<16x128xf32>
    %114 = arith.addf %106, %113 : vector<16x128xf32>
    %115 = vector.broadcast %41 : vector<1x128xf32> to vector<16x128xf32>
    %116 = arith.addf %114, %115 : vector<16x128xf32>
    %cst_57 = arith.constant 0.000000e+00 : f32
    %cst_58 = arith.constant 6.000000e+00 : f32
    %117 = vector.broadcast %cst_57 : f32 to vector<16x128xf32>
    %118 = arith.maximumf %117, %116 : vector<16x128xf32>
    %119 = vector.broadcast %cst_58 : f32 to vector<16x128xf32>
    %120 = arith.minimumf %119, %118 : vector<16x128xf32>
    %c0_59 = arith.constant 0 : index
    %c0_60 = arith.constant 0 : index
    %121 = vector.load %arg11[%c0_59, %c0_60] : memref<128x128xf32, #tpu.memory_space<vmem>>, vector<16x128xf32>
    tpu.vector_store %arg11[%c0_59, %c0_60], %120 {strides = array<i32>} : memref<128x128xf32, #tpu.memory_space<vmem>>, vector<16x128xf32>,
    %cst_61 = arith.constant 0.000000e+00 : f32
    %122 = vector.broadcast %cst_61 : f32 to vector<16x128xf32>
    %c1_62 = arith.constant 1 : index
    %c0_63 = arith.constant 0 : index
    %c0_64 = arith.constant 0 : index
    %c0_65 = arith.constant 0 : index
    %123 = vector.load %arg10[%c1_62, %c0_63, %c0_64, %c0_65] : memref<10x1x24x128xf32, #tpu.memory_space<vmem>>, vector<1x1x16x128xf32>
    %124 = vector.shape_cast %123 : vector<1x1x16x128xf32> to vector<16x128xf32>
    %125 = vector.extract_strided_slice %40 {offsets = [0, 0, 0], sizes = [1, 1, 128], strides = [1, 1, 1]} : vector<3x3x128xf32> to vector<1x1x128xf32>
    %126 = vector.shape_cast %125 : vector<1x1x128xf32> to vector<128xf32>
    %127 = vector.shape_cast %126 : vector<128xf32> to vector<1x128xf32>
    %128 = vector.broadcast %127 : vector<1x128xf32> to vector<16x128xf32>
    %129 = arith.mulf %124, %128 : vector<16x128xf32>
    %130 = arith.addf %122, %129 : vector<16x128xf32>
    %c1_66 = arith.constant 1 : index
    %c0_67 = arith.constant 0 : index
    %c1_68 = arith.constant 1 : index
    %c0_69 = arith.constant 0 : index
    %131 = vector.load %arg10[%c1_66, %c0_67, %c1_68, %c0_69] : memref<10x1x24x128xf32, #tpu.memory_space<vmem>>, vector<1x1x16x128xf32>
    %132 = vector.shape_cast %131 : vector<1x1x16x128xf32> to vector<16x128xf32>
    %133 = vector.extract_strided_slice %40 {offsets = [0, 1, 0], sizes = [1, 1, 128], strides = [1, 1, 1]} : vector<3x3x128xf32> to vector<1x1x128xf32>
    %134 = vector.shape_cast %133 : vector<1x1x128xf32> to vector<128xf32>
    %135 = vector.shape_cast %134 : vector<128xf32> to vector<1x128xf32>
    %136 = vector.broadcast %135 : vector<1x128xf32> to vector<16x128xf32>
    %137 = arith.mulf %132, %136 : vector<16x128xf32>
    %138 = arith.addf %130, %137 : vector<16x128xf32>
    %c1_70 = arith.constant 1 : index
    %c0_71 = arith.constant 0 : index
    %c2_72 = arith.constant 2 : index
    %c0_73 = arith.constant 0 : index
    %139 = vector.load %arg10[%c1_70, %c0_71, %c2_72, %c0_73] : memref<10x1x24x128xf32, #tpu.memory_space<vmem>>, vector<1x1x16x128xf32>
    %140 = vector.shape_cast %139 : vector<1x1x16x128xf32> to vector<16x128xf32>
    %141 = vector.extract_strided_slice %40 {offsets = [0, 2, 0], sizes = [1, 1, 128], strides = [1, 1, 1]} : vector<3x3x128xf32> to vector<1x1x128xf32>
    %142 = vector.shape_cast %141 : vector<1x1x128xf32> to vector<128xf32>
    %143 = vector.shape_cast %142 : vector<128xf32> to vector<1x128xf32>
    %144 = vector.broadcast %143 : vector<1x128xf32> to vector<16x128xf32>
    %145 = arith.mulf %140, %144 : vector<16x128xf32>
    %146 = arith.addf %138, %145 : vector<16x128xf32>
    %c2_74 = arith.constant 2 : index
    %c0_75 = arith.constant 0 : index
    %c0_76 = arith.constant 0 : index
    %c0_77 = arith.constant 0 : index
    %147 = vector.load %arg10[%c2_74, %c0_75, %c0_76, %c0_77] : memref<10x1x24x128xf32, #tpu.memory_space<vmem>>, vector<1x1x16x128xf32>
    %148 = vector.shape_cast %147 : vector<1x1x16x128xf32> to vector<16x128xf32>
    %149 = vector.extract_strided_slice %40 {offsets = [1, 0, 0], sizes = [1, 1, 128], strides = [1, 1, 1]} : vector<3x3x128xf32> to vector<1x1x128xf32>
    %150 = vector.shape_cast %149 : vector<1x1x128xf32> to vector<128xf32>
    %151 = vector.shape_cast %150 : vector<128xf32> to vector<1x128xf32>
    %152 = vector.broadcast %151 : vector<1x128xf32> to vector<16x128xf32>
    %153 = arith.mulf %148, %152 : vector<16x128xf32>
    %154 = arith.addf %146, %153 : vector<16x128xf32>
    %c2_78 = arith.constant 2 : index
    %c0_79 = arith.constant 0 : index
    %c1_80 = arith.constant 1 : index
    %c0_81 = arith.constant 0 : index
    %155 = vector.load %arg10[%c2_78, %c0_79, %c1_80, %c0_81] : memref<10x1x24x128xf32, #tpu.memory_space<vmem>>, vector<1x1x16x128xf32>
    %156 = vector.shape_cast %155 : vector<1x1x16x128xf32> to vector<16x128xf32>
    %157 = vector.extract_strided_slice %40 {offsets = [1, 1, 0], sizes = [1, 1, 128], strides = [1, 1, 1]} : vector<3x3x128xf32> to vector<1x1x128xf32>
    %158 = vector.shape_cast %157 : vector<1x1x128xf32> to vector<128xf32>
    %159 = vector.shape_cast %158 : vector<128xf32> to vector<1x128xf32>
    %160 = vector.broadcast %159 : vector<1x128xf32> to vector<16x128xf32>
    %161 = arith.mulf %156, %160 : vector<16x128xf32>
    %162 = arith.addf %154, %161 : vector<16x128xf32>
    %c2_82 = arith.constant 2 : index
    %c0_83 = arith.constant 0 : index
    %c2_84 = arith.constant 2 : index
    %c0_85 = arith.constant 0 : index
    %163 = vector.load %arg10[%c2_82, %c0_83, %c2_84, %c0_85] : memref<10x1x24x128xf32, #tpu.memory_space<vmem>>, vector<1x1x16x128xf32>
    %164 = vector.shape_cast %163 : vector<1x1x16x128xf32> to vector<16x128xf32>
    %165 = vector.extract_strided_slice %40 {offsets = [1, 2, 0], sizes = [1, 1, 128], strides = [1, 1, 1]} : vector<3x3x128xf32> to vector<1x1x128xf32>
    %166 = vector.shape_cast %165 : vector<1x1x128xf32> to vector<128xf32>
    %167 = vector.shape_cast %166 : vector<128xf32> to vector<1x128xf32>
    %168 = vector.broadcast %167 : vector<1x128xf32> to vector<16x128xf32>
    %169 = arith.mulf %164, %168 : vector<16x128xf32>
    %170 = arith.addf %162, %169 : vector<16x128xf32>
    %c3 = arith.constant 3 : index
    %c0_86 = arith.constant 0 : index
    %c0_87 = arith.constant 0 : index
    %c0_88 = arith.constant 0 : index
    %171 = vector.load %arg10[%c3, %c0_86, %c0_87, %c0_88] : memref<10x1x24x128xf32, #tpu.memory_space<vmem>>, vector<1x1x16x128xf32>
    %172 = vector.shape_cast %171 : vector<1x1x16x128xf32> to vector<16x128xf32>
    %173 = vector.extract_strided_slice %40 {offsets = [2, 0, 0], sizes = [1, 1, 128], strides = [1, 1, 1]} : vector<3x3x128xf32> to vector<1x1x128xf32>
    %174 = vector.shape_cast %173 : vector<1x1x128xf32> to vector<128xf32>
    %175 = vector.shape_cast %174 : vector<128xf32> to vector<1x128xf32>
    %176 = vector.broadcast %175 : vector<1x128xf32> to vector<16x128xf32>
    %177 = arith.mulf %172, %176 : vector<16x128xf32>
    %178 = arith.addf %170, %177 : vector<16x128xf32>
    %c3_89 = arith.constant 3 : index
    %c0_90 = arith.constant 0 : index
    %c1_91 = arith.constant 1 : index
    %c0_92 = arith.constant 0 : index
    %179 = vector.load %arg10[%c3_89, %c0_90, %c1_91, %c0_92] : memref<10x1x24x128xf32, #tpu.memory_space<vmem>>, vector<1x1x16x128xf32>
    %180 = vector.shape_cast %179 : vector<1x1x16x128xf32> to vector<16x128xf32>
    %181 = vector.extract_strided_slice %40 {offsets = [2, 1, 0], sizes = [1, 1, 128], strides = [1, 1, 1]} : vector<3x3x128xf32> to vector<1x1x128xf32>
    %182 = vector.shape_cast %181 : vector<1x1x128xf32> to vector<128xf32>
    %183 = vector.shape_cast %182 : vector<128xf32> to vector<1x128xf32>
    %184 = vector.broadcast %183 : vector<1x128xf32> to vector<16x128xf32>
    %185 = arith.mulf %180, %184 : vector<16x128xf32>
    %186 = arith.addf %178, %185 : vector<16x128xf32>
    %c3_93 = arith.constant 3 : index
    %c0_94 = arith.constant 0 : index
    %c2_95 = arith.constant 2 : index
    %c0_96 = arith.constant 0 : index
    %187 = vector.load %arg10[%c3_93, %c0_94, %c2_95, %c0_96] : memref<10x1x24x128xf32, #tpu.memory_space<vmem>>, vector<1x1x16x128xf32>
    %188 = vector.shape_cast %187 : vector<1x1x16x128xf32> to vector<16x128xf32>
    %189 = vector.extract_strided_slice %40 {offsets = [2, 2, 0], sizes = [1, 1, 128], strides = [1, 1, 1]} : vector<3x3x128xf32> to vector<1x1x128xf32>
    %190 = vector.shape_cast %189 : vector<1x1x128xf32> to vector<128xf32>
    %191 = vector.shape_cast %190 : vector<128xf32> to vector<1x128xf32>
    %192 = vector.broadcast %191 : vector<1x128xf32> to vector<16x128xf32>
    %193 = arith.mulf %188, %192 : vector<16x128xf32>
    %194 = arith.addf %186, %193 : vector<16x128xf32>
    %195 = vector.broadcast %41 : vector<1x128xf32> to vector<16x128xf32>
    %196 = arith.addf %194, %195 : vector<16x128xf32>
    %cst_97 = arith.constant 0.000000e+00 : f32
    %cst_98 = arith.constant 6.000000e+00 : f32
    %197 = vector.broadcast %cst_97 : f32 to vector<16x128xf32>
    %198 = arith.maximumf %197, %196 : vector<16x128xf32>
    %199 = vector.broadcast %cst_98 : f32 to vector<16x128xf32>
    %200 = arith.minimumf %199, %198 : vector<16x128xf32>
    %c16 = arith.constant 16 : index
    %c0_99 = arith.constant 0 : index
    %201 = vector.load %arg11[%c16, %c0_99] : memref<128x128xf32, #tpu.memory_space<vmem>>, vector<16x128xf32>
    tpu.vector_store %arg11[%c16, %c0_99], %200 {strides = array<i32>} : memref<128x128xf32, #tpu.memory_space<vmem>>, vector<16x128xf32>,
    %cst_100 = arith.constant 0.000000e+00 : f32
    %202 = vector.broadcast %cst_100 : f32 to vector<16x128xf32>
    %c2_101 = arith.constant 2 : index
    %c0_102 = arith.constant 0 : index
    %c0_103 = arith.constant 0 : index
    %c0_104 = arith.constant 0 : index
    %203 = vector.load %arg10[%c2_101, %c0_102, %c0_103, %c0_104] : memref<10x1x24x128xf32, #tpu.memory_space<vmem>>, vector<1x1x16x128xf32>
    %204 = vector.shape_cast %203 : vector<1x1x16x128xf32> to vector<16x128xf32>
    %205 = vector.extract_strided_slice %40 {offsets = [0, 0, 0], sizes = [1, 1, 128], strides = [1, 1, 1]} : vector<3x3x128xf32> to vector<1x1x128xf32>
    %206 = vector.shape_cast %205 : vector<1x1x128xf32> to vector<128xf32>
    %207 = vector.shape_cast %206 : vector<128xf32> to vector<1x128xf32>
    %208 = vector.broadcast %207 : vector<1x128xf32> to vector<16x128xf32>
    %209 = arith.mulf %204, %208 : vector<16x128xf32>
    %210 = arith.addf %202, %209 : vector<16x128xf32>
    %c2_105 = arith.constant 2 : index
    %c0_106 = arith.constant 0 : index
    %c1_107 = arith.constant 1 : index
    %c0_108 = arith.constant 0 : index
    %211 = vector.load %arg10[%c2_105, %c0_106, %c1_107, %c0_108] : memref<10x1x24x128xf32, #tpu.memory_space<vmem>>, vector<1x1x16x128xf32>
    %212 = vector.shape_cast %211 : vector<1x1x16x128xf32> to vector<16x128xf32>
    %213 = vector.extract_strided_slice %40 {offsets = [0, 1, 0], sizes = [1, 1, 128], strides = [1, 1, 1]} : vector<3x3x128xf32> to vector<1x1x128xf32>
    %214 = vector.shape_cast %213 : vector<1x1x128xf32> to vector<128xf32>
    %215 = vector.shape_cast %214 : vector<128xf32> to vector<1x128xf32>
    %216 = vector.broadcast %215 : vector<1x128xf32> to vector<16x128xf32>
    %217 = arith.mulf %212, %216 : vector<16x128xf32>
    %218 = arith.addf %210, %217 : vector<16x128xf32>
    %c2_109 = arith.constant 2 : index
    %c0_110 = arith.constant 0 : index
    %c2_111 = arith.constant 2 : index
    %c0_112 = arith.constant 0 : index
    %219 = vector.load %arg10[%c2_109, %c0_110, %c2_111, %c0_112] : memref<10x1x24x128xf32, #tpu.memory_space<vmem>>, vector<1x1x16x128xf32>
    %220 = vector.shape_cast %219 : vector<1x1x16x128xf32> to vector<16x128xf32>
    %221 = vector.extract_strided_slice %40 {offsets = [0, 2, 0], sizes = [1, 1, 128], strides = [1, 1, 1]} : vector<3x3x128xf32> to vector<1x1x128xf32>
    %222 = vector.shape_cast %221 : vector<1x1x128xf32> to vector<128xf32>
    %223 = vector.shape_cast %222 : vector<128xf32> to vector<1x128xf32>
    %224 = vector.broadcast %223 : vector<1x128xf32> to vector<16x128xf32>
    %225 = arith.mulf %220, %224 : vector<16x128xf32>
    %226 = arith.addf %218, %225 : vector<16x128xf32>
    %c3_113 = arith.constant 3 : index
    %c0_114 = arith.constant 0 : index
    %c0_115 = arith.constant 0 : index
    %c0_116 = arith.constant 0 : index
    %227 = vector.load %arg10[%c3_113, %c0_114, %c0_115, %c0_116] : memref<10x1x24x128xf32, #tpu.memory_space<vmem>>, vector<1x1x16x128xf32>
    %228 = vector.shape_cast %227 : vector<1x1x16x128xf32> to vector<16x128xf32>
    %229 = vector.extract_strided_slice %40 {offsets = [1, 0, 0], sizes = [1, 1, 128], strides = [1, 1, 1]} : vector<3x3x128xf32> to vector<1x1x128xf32>
    %230 = vector.shape_cast %229 : vector<1x1x128xf32> to vector<128xf32>
    %231 = vector.shape_cast %230 : vector<128xf32> to vector<1x128xf32>
    %232 = vector.broadcast %231 : vector<1x128xf32> to vector<16x128xf32>
    %233 = arith.mulf %228, %232 : vector<16x128xf32>
    %234 = arith.addf %226, %233 : vector<16x128xf32>
    %c3_117 = arith.constant 3 : index
    %c0_118 = arith.constant 0 : index
    %c1_119 = arith.constant 1 : index
    %c0_120 = arith.constant 0 : index
    %235 = vector.load %arg10[%c3_117, %c0_118, %c1_119, %c0_120] : memref<10x1x24x128xf32, #tpu.memory_space<vmem>>, vector<1x1x16x128xf32>
    %236 = vector.shape_cast %235 : vector<1x1x16x128xf32> to vector<16x128xf32>
    %237 = vector.extract_strided_slice %40 {offsets = [1, 1, 0], sizes = [1, 1, 128], strides = [1, 1, 1]} : vector<3x3x128xf32> to vector<1x1x128xf32>
    %238 = vector.shape_cast %237 : vector<1x1x128xf32> to vector<128xf32>
    %239 = vector.shape_cast %238 : vector<128xf32> to vector<1x128xf32>
    %240 = vector.broadcast %239 : vector<1x128xf32> to vector<16x128xf32>
    %241 = arith.mulf %236, %240 : vector<16x128xf32>
    %242 = arith.addf %234, %241 : vector<16x128xf32>
    %c3_121 = arith.constant 3 : index
    %c0_122 = arith.constant 0 : index
    %c2_123 = arith.constant 2 : index
    %c0_124 = arith.constant 0 : index
    %243 = vector.load %arg10[%c3_121, %c0_122, %c2_123, %c0_124] : memref<10x1x24x128xf32, #tpu.memory_space<vmem>>, vector<1x1x16x128xf32>
    %244 = vector.shape_cast %243 : vector<1x1x16x128xf32> to vector<16x128xf32>
    %245 = vector.extract_strided_slice %40 {offsets = [1, 2, 0], sizes = [1, 1, 128], strides = [1, 1, 1]} : vector<3x3x128xf32> to vector<1x1x128xf32>
    %246 = vector.shape_cast %245 : vector<1x1x128xf32> to vector<128xf32>
    %247 = vector.shape_cast %246 : vector<128xf32> to vector<1x128xf32>
    %248 = vector.broadcast %247 : vector<1x128xf32> to vector<16x128xf32>
    %249 = arith.mulf %244, %248 : vector<16x128xf32>
    %250 = arith.addf %242, %249 : vector<16x128xf32>
    %c4 = arith.constant 4 : index
    %c0_125 = arith.constant 0 : index
    %c0_126 = arith.constant 0 : index
    %c0_127 = arith.constant 0 : index
    %251 = vector.load %arg10[%c4, %c0_125, %c0_126, %c0_127] : memref<10x1x24x128xf32, #tpu.memory_space<vmem>>, vector<1x1x16x128xf32>
    %252 = vector.shape_cast %251 : vector<1x1x16x128xf32> to vector<16x128xf32>
    %253 = vector.extract_strided_slice %40 {offsets = [2, 0, 0], sizes = [1, 1, 128], strides = [1, 1, 1]} : vector<3x3x128xf32> to vector<1x1x128xf32>
    %254 = vector.shape_cast %253 : vector<1x1x128xf32> to vector<128xf32>
    %255 = vector.shape_cast %254 : vector<128xf32> to vector<1x128xf32>
    %256 = vector.broadcast %255 : vector<1x128xf32> to vector<16x128xf32>
    %257 = arith.mulf %252, %256 : vector<16x128xf32>
    %258 = arith.addf %250, %257 : vector<16x128xf32>
    %c4_128 = arith.constant 4 : index
    %c0_129 = arith.constant 0 : index
    %c1_130 = arith.constant 1 : index
    %c0_131 = arith.constant 0 : index
    %259 = vector.load %arg10[%c4_128, %c0_129, %c1_130, %c0_131] : memref<10x1x24x128xf32, #tpu.memory_space<vmem>>, vector<1x1x16x128xf32>
    %260 = vector.shape_cast %259 : vector<1x1x16x128xf32> to vector<16x128xf32>
    %261 = vector.extract_strided_slice %40 {offsets = [2, 1, 0], sizes = [1, 1, 128], strides = [1, 1, 1]} : vector<3x3x128xf32> to vector<1x1x128xf32>
    %262 = vector.shape_cast %261 : vector<1x1x128xf32> to vector<128xf32>
    %263 = vector.shape_cast %262 : vector<128xf32> to vector<1x128xf32>
    %264 = vector.broadcast %263 : vector<1x128xf32> to vector<16x128xf32>
    %265 = arith.mulf %260, %264 : vector<16x128xf32>
    %266 = arith.addf %258, %265 : vector<16x128xf32>
    %c4_132 = arith.constant 4 : index
    %c0_133 = arith.constant 0 : index
    %c2_134 = arith.constant 2 : index
    %c0_135 = arith.constant 0 : index
    %267 = vector.load %arg10[%c4_132, %c0_133, %c2_134, %c0_135] : memref<10x1x24x128xf32, #tpu.memory_space<vmem>>, vector<1x1x16x128xf32>
    %268 = vector.shape_cast %267 : vector<1x1x16x128xf32> to vector<16x128xf32>
    %269 = vector.extract_strided_slice %40 {offsets = [2, 2, 0], sizes = [1, 1, 128], strides = [1, 1, 1]} : vector<3x3x128xf32> to vector<1x1x128xf32>
    %270 = vector.shape_cast %269 : vector<1x1x128xf32> to vector<128xf32>
    %271 = vector.shape_cast %270 : vector<128xf32> to vector<1x128xf32>
    %272 = vector.broadcast %271 : vector<1x128xf32> to vector<16x128xf32>
    %273 = arith.mulf %268, %272 : vector<16x128xf32>
    %274 = arith.addf %266, %273 : vector<16x128xf32>
    %275 = vector.broadcast %41 : vector<1x128xf32> to vector<16x128xf32>
    %276 = arith.addf %274, %275 : vector<16x128xf32>
    %cst_136 = arith.constant 0.000000e+00 : f32
    %cst_137 = arith.constant 6.000000e+00 : f32
    %277 = vector.broadcast %cst_136 : f32 to vector<16x128xf32>
    %278 = arith.maximumf %277, %276 : vector<16x128xf32>
    %279 = vector.broadcast %cst_137 : f32 to vector<16x128xf32>
    %280 = arith.minimumf %279, %278 : vector<16x128xf32>
    %c32 = arith.constant 32 : index
    %c0_138 = arith.constant 0 : index
    %281 = vector.load %arg11[%c32, %c0_138] : memref<128x128xf32, #tpu.memory_space<vmem>>, vector<16x128xf32>
    tpu.vector_store %arg11[%c32, %c0_138], %280 {strides = array<i32>} : memref<128x128xf32, #tpu.memory_space<vmem>>, vector<16x128xf32>,
    %cst_139 = arith.constant 0.000000e+00 : f32
    %282 = vector.broadcast %cst_139 : f32 to vector<16x128xf32>
    %c3_140 = arith.constant 3 : index
    %c0_141 = arith.constant 0 : index
    %c0_142 = arith.constant 0 : index
    %c0_143 = arith.constant 0 : index
    %283 = vector.load %arg10[%c3_140, %c0_141, %c0_142, %c0_143] : memref<10x1x24x128xf32, #tpu.memory_space<vmem>>, vector<1x1x16x128xf32>
    %284 = vector.shape_cast %283 : vector<1x1x16x128xf32> to vector<16x128xf32>
    %285 = vector.extract_strided_slice %40 {offsets = [0, 0, 0], sizes = [1, 1, 128], strides = [1, 1, 1]} : vector<3x3x128xf32> to vector<1x1x128xf32>
    %286 = vector.shape_cast %285 : vector<1x1x128xf32> to vector<128xf32>
    %287 = vector.shape_cast %286 : vector<128xf32> to vector<1x128xf32>
    %288 = vector.broadcast %287 : vector<1x128xf32> to vector<16x128xf32>
    %289 = arith.mulf %284, %288 : vector<16x128xf32>
    %290 = arith.addf %282, %289 : vector<16x128xf32>
    %c3_144 = arith.constant 3 : index
    %c0_145 = arith.constant 0 : index
    %c1_146 = arith.constant 1 : index
    %c0_147 = arith.constant 0 : index
    %291 = vector.load %arg10[%c3_144, %c0_145, %c1_146, %c0_147] : memref<10x1x24x128xf32, #tpu.memory_space<vmem>>, vector<1x1x16x128xf32>
    %292 = vector.shape_cast %291 : vector<1x1x16x128xf32> to vector<16x128xf32>
    %293 = vector.extract_strided_slice %40 {offsets = [0, 1, 0], sizes = [1, 1, 128], strides = [1, 1, 1]} : vector<3x3x128xf32> to vector<1x1x128xf32>
    %294 = vector.shape_cast %293 : vector<1x1x128xf32> to vector<128xf32>
    %295 = vector.shape_cast %294 : vector<128xf32> to vector<1x128xf32>
    %296 = vector.broadcast %295 : vector<1x128xf32> to vector<16x128xf32>
    %297 = arith.mulf %292, %296 : vector<16x128xf32>
    %298 = arith.addf %290, %297 : vector<16x128xf32>
    %c3_148 = arith.constant 3 : index
    %c0_149 = arith.constant 0 : index
    %c2_150 = arith.constant 2 : index
    %c0_151 = arith.constant 0 : index
    %299 = vector.load %arg10[%c3_148, %c0_149, %c2_150, %c0_151] : memref<10x1x24x128xf32, #tpu.memory_space<vmem>>, vector<1x1x16x128xf32>
    %300 = vector.shape_cast %299 : vector<1x1x16x128xf32> to vector<16x128xf32>
    %301 = vector.extract_strided_slice %40 {offsets = [0, 2, 0], sizes = [1, 1, 128], strides = [1, 1, 1]} : vector<3x3x128xf32> to vector<1x1x128xf32>
    %302 = vector.shape_cast %301 : vector<1x1x128xf32> to vector<128xf32>
    %303 = vector.shape_cast %302 : vector<128xf32> to vector<1x128xf32>
    %304 = vector.broadcast %303 : vector<1x128xf32> to vector<16x128xf32>
    %305 = arith.mulf %300, %304 : vector<16x128xf32>
    %306 = arith.addf %298, %305 : vector<16x128xf32>
    %c4_152 = arith.constant 4 : index
    %c0_153 = arith.constant 0 : index
    %c0_154 = arith.constant 0 : index
    %c0_155 = arith.constant 0 : index
    %307 = vector.load %arg10[%c4_152, %c0_153, %c0_154, %c0_155] : memref<10x1x24x128xf32, #tpu.memory_space<vmem>>, vector<1x1x16x128xf32>
    %308 = vector.shape_cast %307 : vector<1x1x16x128xf32> to vector<16x128xf32>
    %309 = vector.extract_strided_slice %40 {offsets = [1, 0, 0], sizes = [1, 1, 128], strides = [1, 1, 1]} : vector<3x3x128xf32> to vector<1x1x128xf32>
    %310 = vector.shape_cast %309 : vector<1x1x128xf32> to vector<128xf32>
    %311 = vector.shape_cast %310 : vector<128xf32> to vector<1x128xf32>
    %312 = vector.broadcast %311 : vector<1x128xf32> to vector<16x128xf32>
    %313 = arith.mulf %308, %312 : vector<16x128xf32>
    %314 = arith.addf %306, %313 : vector<16x128xf32>
    %c4_156 = arith.constant 4 : index
    %c0_157 = arith.constant 0 : index
    %c1_158 = arith.constant 1 : index
    %c0_159 = arith.constant 0 : index
    %315 = vector.load %arg10[%c4_156, %c0_157, %c1_158, %c0_159] : memref<10x1x24x128xf32, #tpu.memory_space<vmem>>, vector<1x1x16x128xf32>
    %316 = vector.shape_cast %315 : vector<1x1x16x128xf32> to vector<16x128xf32>
    %317 = vector.extract_strided_slice %40 {offsets = [1, 1, 0], sizes = [1, 1, 128], strides = [1, 1, 1]} : vector<3x3x128xf32> to vector<1x1x128xf32>
    %318 = vector.shape_cast %317 : vector<1x1x128xf32> to vector<128xf32>
    %319 = vector.shape_cast %318 : vector<128xf32> to vector<1x128xf32>
    %320 = vector.broadcast %319 : vector<1x128xf32> to vector<16x128xf32>
    %321 = arith.mulf %316, %320 : vector<16x128xf32>
    %322 = arith.addf %314, %321 : vector<16x128xf32>
    %c4_160 = arith.constant 4 : index
    %c0_161 = arith.constant 0 : index
    %c2_162 = arith.constant 2 : index
    %c0_163 = arith.constant 0 : index
    %323 = vector.load %arg10[%c4_160, %c0_161, %c2_162, %c0_163] : memref<10x1x24x128xf32, #tpu.memory_space<vmem>>, vector<1x1x16x128xf32>
    %324 = vector.shape_cast %323 : vector<1x1x16x128xf32> to vector<16x128xf32>
    %325 = vector.extract_strided_slice %40 {offsets = [1, 2, 0], sizes = [1, 1, 128], strides = [1, 1, 1]} : vector<3x3x128xf32> to vector<1x1x128xf32>
    %326 = vector.shape_cast %325 : vector<1x1x128xf32> to vector<128xf32>
    %327 = vector.shape_cast %326 : vector<128xf32> to vector<1x128xf32>
    %328 = vector.broadcast %327 : vector<1x128xf32> to vector<16x128xf32>
    %329 = arith.mulf %324, %328 : vector<16x128xf32>
    %330 = arith.addf %322, %329 : vector<16x128xf32>
    %c5 = arith.constant 5 : index
    %c0_164 = arith.constant 0 : index
    %c0_165 = arith.constant 0 : index
    %c0_166 = arith.constant 0 : index
    %331 = vector.load %arg10[%c5, %c0_164, %c0_165, %c0_166] : memref<10x1x24x128xf32, #tpu.memory_space<vmem>>, vector<1x1x16x128xf32>
    %332 = vector.shape_cast %331 : vector<1x1x16x128xf32> to vector<16x128xf32>
    %333 = vector.extract_strided_slice %40 {offsets = [2, 0, 0], sizes = [1, 1, 128], strides = [1, 1, 1]} : vector<3x3x128xf32> to vector<1x1x128xf32>
    %334 = vector.shape_cast %333 : vector<1x1x128xf32> to vector<128xf32>
    %335 = vector.shape_cast %334 : vector<128xf32> to vector<1x128xf32>
    %336 = vector.broadcast %335 : vector<1x128xf32> to vector<16x128xf32>
    %337 = arith.mulf %332, %336 : vector<16x128xf32>
    %338 = arith.addf %330, %337 : vector<16x128xf32>
    %c5_167 = arith.constant 5 : index
    %c0_168 = arith.constant 0 : index
    %c1_169 = arith.constant 1 : index
    %c0_170 = arith.constant 0 : index
    %339 = vector.load %arg10[%c5_167, %c0_168, %c1_169, %c0_170] : memref<10x1x24x128xf32, #tpu.memory_space<vmem>>, vector<1x1x16x128xf32>
    %340 = vector.shape_cast %339 : vector<1x1x16x128xf32> to vector<16x128xf32>
    %341 = vector.extract_strided_slice %40 {offsets = [2, 1, 0], sizes = [1, 1, 128], strides = [1, 1, 1]} : vector<3x3x128xf32> to vector<1x1x128xf32>
    %342 = vector.shape_cast %341 : vector<1x1x128xf32> to vector<128xf32>
    %343 = vector.shape_cast %342 : vector<128xf32> to vector<1x128xf32>
    %344 = vector.broadcast %343 : vector<1x128xf32> to vector<16x128xf32>
    %345 = arith.mulf %340, %344 : vector<16x128xf32>
    %346 = arith.addf %338, %345 : vector<16x128xf32>
    %c5_171 = arith.constant 5 : index
    %c0_172 = arith.constant 0 : index
    %c2_173 = arith.constant 2 : index
    %c0_174 = arith.constant 0 : index
    %347 = vector.load %arg10[%c5_171, %c0_172, %c2_173, %c0_174] : memref<10x1x24x128xf32, #tpu.memory_space<vmem>>, vector<1x1x16x128xf32>
    %348 = vector.shape_cast %347 : vector<1x1x16x128xf32> to vector<16x128xf32>
    %349 = vector.extract_strided_slice %40 {offsets = [2, 2, 0], sizes = [1, 1, 128], strides = [1, 1, 1]} : vector<3x3x128xf32> to vector<1x1x128xf32>
    %350 = vector.shape_cast %349 : vector<1x1x128xf32> to vector<128xf32>
    %351 = vector.shape_cast %350 : vector<128xf32> to vector<1x128xf32>
    %352 = vector.broadcast %351 : vector<1x128xf32> to vector<16x128xf32>
    %353 = arith.mulf %348, %352 : vector<16x128xf32>
    %354 = arith.addf %346, %353 : vector<16x128xf32>
    %355 = vector.broadcast %41 : vector<1x128xf32> to vector<16x128xf32>
    %356 = arith.addf %354, %355 : vector<16x128xf32>
    %cst_175 = arith.constant 0.000000e+00 : f32
    %cst_176 = arith.constant 6.000000e+00 : f32
    %357 = vector.broadcast %cst_175 : f32 to vector<16x128xf32>
    %358 = arith.maximumf %357, %356 : vector<16x128xf32>
    %359 = vector.broadcast %cst_176 : f32 to vector<16x128xf32>
    %360 = arith.minimumf %359, %358 : vector<16x128xf32>
    %c48 = arith.constant 48 : index
    %c0_177 = arith.constant 0 : index
    %361 = vector.load %arg11[%c48, %c0_177] : memref<128x128xf32, #tpu.memory_space<vmem>>, vector<16x128xf32>
    tpu.vector_store %arg11[%c48, %c0_177], %360 {strides = array<i32>} : memref<128x128xf32, #tpu.memory_space<vmem>>, vector<16x128xf32>,
    %cst_178 = arith.constant 0.000000e+00 : f32
    %362 = vector.broadcast %cst_178 : f32 to vector<16x128xf32>
    %c4_179 = arith.constant 4 : index
    %c0_180 = arith.constant 0 : index
    %c0_181 = arith.constant 0 : index
    %c0_182 = arith.constant 0 : index
    %363 = vector.load %arg10[%c4_179, %c0_180, %c0_181, %c0_182] : memref<10x1x24x128xf32, #tpu.memory_space<vmem>>, vector<1x1x16x128xf32>
    %364 = vector.shape_cast %363 : vector<1x1x16x128xf32> to vector<16x128xf32>
    %365 = vector.extract_strided_slice %40 {offsets = [0, 0, 0], sizes = [1, 1, 128], strides = [1, 1, 1]} : vector<3x3x128xf32> to vector<1x1x128xf32>
    %366 = vector.shape_cast %365 : vector<1x1x128xf32> to vector<128xf32>
    %367 = vector.shape_cast %366 : vector<128xf32> to vector<1x128xf32>
    %368 = vector.broadcast %367 : vector<1x128xf32> to vector<16x128xf32>
    %369 = arith.mulf %364, %368 : vector<16x128xf32>
    %370 = arith.addf %362, %369 : vector<16x128xf32>
    %c4_183 = arith.constant 4 : index
    %c0_184 = arith.constant 0 : index
    %c1_185 = arith.constant 1 : index
    %c0_186 = arith.constant 0 : index
    %371 = vector.load %arg10[%c4_183, %c0_184, %c1_185, %c0_186] : memref<10x1x24x128xf32, #tpu.memory_space<vmem>>, vector<1x1x16x128xf32>
    %372 = vector.shape_cast %371 : vector<1x1x16x128xf32> to vector<16x128xf32>
    %373 = vector.extract_strided_slice %40 {offsets = [0, 1, 0], sizes = [1, 1, 128], strides = [1, 1, 1]} : vector<3x3x128xf32> to vector<1x1x128xf32>
    %374 = vector.shape_cast %373 : vector<1x1x128xf32> to vector<128xf32>
    %375 = vector.shape_cast %374 : vector<128xf32> to vector<1x128xf32>
    %376 = vector.broadcast %375 : vector<1x128xf32> to vector<16x128xf32>
    %377 = arith.mulf %372, %376 : vector<16x128xf32>
    %378 = arith.addf %370, %377 : vector<16x128xf32>
    %c4_187 = arith.constant 4 : index
    %c0_188 = arith.constant 0 : index
    %c2_189 = arith.constant 2 : index
    %c0_190 = arith.constant 0 : index
    %379 = vector.load %arg10[%c4_187, %c0_188, %c2_189, %c0_190] : memref<10x1x24x128xf32, #tpu.memory_space<vmem>>, vector<1x1x16x128xf32>
    %380 = vector.shape_cast %379 : vector<1x1x16x128xf32> to vector<16x128xf32>
    %381 = vector.extract_strided_slice %40 {offsets = [0, 2, 0], sizes = [1, 1, 128], strides = [1, 1, 1]} : vector<3x3x128xf32> to vector<1x1x128xf32>
    %382 = vector.shape_cast %381 : vector<1x1x128xf32> to vector<128xf32>
    %383 = vector.shape_cast %382 : vector<128xf32> to vector<1x128xf32>
    %384 = vector.broadcast %383 : vector<1x128xf32> to vector<16x128xf32>
    %385 = arith.mulf %380, %384 : vector<16x128xf32>
    %386 = arith.addf %378, %385 : vector<16x128xf32>
    %c5_191 = arith.constant 5 : index
    %c0_192 = arith.constant 0 : index
    %c0_193 = arith.constant 0 : index
    %c0_194 = arith.constant 0 : index
    %387 = vector.load %arg10[%c5_191, %c0_192, %c0_193, %c0_194] : memref<10x1x24x128xf32, #tpu.memory_space<vmem>>, vector<1x1x16x128xf32>
    %388 = vector.shape_cast %387 : vector<1x1x16x128xf32> to vector<16x128xf32>
    %389 = vector.extract_strided_slice %40 {offsets = [1, 0, 0], sizes = [1, 1, 128], strides = [1, 1, 1]} : vector<3x3x128xf32> to vector<1x1x128xf32>
    %390 = vector.shape_cast %389 : vector<1x1x128xf32> to vector<128xf32>
    %391 = vector.shape_cast %390 : vector<128xf32> to vector<1x128xf32>
    %392 = vector.broadcast %391 : vector<1x128xf32> to vector<16x128xf32>
    %393 = arith.mulf %388, %392 : vector<16x128xf32>
    %394 = arith.addf %386, %393 : vector<16x128xf32>
    %c5_195 = arith.constant 5 : index
    %c0_196 = arith.constant 0 : index
    %c1_197 = arith.constant 1 : index
    %c0_198 = arith.constant 0 : index
    %395 = vector.load %arg10[%c5_195, %c0_196, %c1_197, %c0_198] : memref<10x1x24x128xf32, #tpu.memory_space<vmem>>, vector<1x1x16x128xf32>
    %396 = vector.shape_cast %395 : vector<1x1x16x128xf32> to vector<16x128xf32>
    %397 = vector.extract_strided_slice %40 {offsets = [1, 1, 0], sizes = [1, 1, 128], strides = [1, 1, 1]} : vector<3x3x128xf32> to vector<1x1x128xf32>
    %398 = vector.shape_cast %397 : vector<1x1x128xf32> to vector<128xf32>
    %399 = vector.shape_cast %398 : vector<128xf32> to vector<1x128xf32>
    %400 = vector.broadcast %399 : vector<1x128xf32> to vector<16x128xf32>
    %401 = arith.mulf %396, %400 : vector<16x128xf32>
    %402 = arith.addf %394, %401 : vector<16x128xf32>
    %c5_199 = arith.constant 5 : index
    %c0_200 = arith.constant 0 : index
    %c2_201 = arith.constant 2 : index
    %c0_202 = arith.constant 0 : index
    %403 = vector.load %arg10[%c5_199, %c0_200, %c2_201, %c0_202] : memref<10x1x24x128xf32, #tpu.memory_space<vmem>>, vector<1x1x16x128xf32>
    %404 = vector.shape_cast %403 : vector<1x1x16x128xf32> to vector<16x128xf32>
    %405 = vector.extract_strided_slice %40 {offsets = [1, 2, 0], sizes = [1, 1, 128], strides = [1, 1, 1]} : vector<3x3x128xf32> to vector<1x1x128xf32>
    %406 = vector.shape_cast %405 : vector<1x1x128xf32> to vector<128xf32>
    %407 = vector.shape_cast %406 : vector<128xf32> to vector<1x128xf32>
    %408 = vector.broadcast %407 : vector<1x128xf32> to vector<16x128xf32>
    %409 = arith.mulf %404, %408 : vector<16x128xf32>
    %410 = arith.addf %402, %409 : vector<16x128xf32>
    %c6 = arith.constant 6 : index
    %c0_203 = arith.constant 0 : index
    %c0_204 = arith.constant 0 : index
    %c0_205 = arith.constant 0 : index
    %411 = vector.load %arg10[%c6, %c0_203, %c0_204, %c0_205] : memref<10x1x24x128xf32, #tpu.memory_space<vmem>>, vector<1x1x16x128xf32>
    %412 = vector.shape_cast %411 : vector<1x1x16x128xf32> to vector<16x128xf32>
    %413 = vector.extract_strided_slice %40 {offsets = [2, 0, 0], sizes = [1, 1, 128], strides = [1, 1, 1]} : vector<3x3x128xf32> to vector<1x1x128xf32>
    %414 = vector.shape_cast %413 : vector<1x1x128xf32> to vector<128xf32>
    %415 = vector.shape_cast %414 : vector<128xf32> to vector<1x128xf32>
    %416 = vector.broadcast %415 : vector<1x128xf32> to vector<16x128xf32>
    %417 = arith.mulf %412, %416 : vector<16x128xf32>
    %418 = arith.addf %410, %417 : vector<16x128xf32>
    %c6_206 = arith.constant 6 : index
    %c0_207 = arith.constant 0 : index
    %c1_208 = arith.constant 1 : index
    %c0_209 = arith.constant 0 : index
    %419 = vector.load %arg10[%c6_206, %c0_207, %c1_208, %c0_209] : memref<10x1x24x128xf32, #tpu.memory_space<vmem>>, vector<1x1x16x128xf32>
    %420 = vector.shape_cast %419 : vector<1x1x16x128xf32> to vector<16x128xf32>
    %421 = vector.extract_strided_slice %40 {offsets = [2, 1, 0], sizes = [1, 1, 128], strides = [1, 1, 1]} : vector<3x3x128xf32> to vector<1x1x128xf32>
    %422 = vector.shape_cast %421 : vector<1x1x128xf32> to vector<128xf32>
    %423 = vector.shape_cast %422 : vector<128xf32> to vector<1x128xf32>
    %424 = vector.broadcast %423 : vector<1x128xf32> to vector<16x128xf32>
    %425 = arith.mulf %420, %424 : vector<16x128xf32>
    %426 = arith.addf %418, %425 : vector<16x128xf32>
    %c6_210 = arith.constant 6 : index
    %c0_211 = arith.constant 0 : index
    %c2_212 = arith.constant 2 : index
    %c0_213 = arith.constant 0 : index
    %427 = vector.load %arg10[%c6_210, %c0_211, %c2_212, %c0_213] : memref<10x1x24x128xf32, #tpu.memory_space<vmem>>, vector<1x1x16x128xf32>
    %428 = vector.shape_cast %427 : vector<1x1x16x128xf32> to vector<16x128xf32>
    %429 = vector.extract_strided_slice %40 {offsets = [2, 2, 0], sizes = [1, 1, 128], strides = [1, 1, 1]} : vector<3x3x128xf32> to vector<1x1x128xf32>
    %430 = vector.shape_cast %429 : vector<1x1x128xf32> to vector<128xf32>
    %431 = vector.shape_cast %430 : vector<128xf32> to vector<1x128xf32>
    %432 = vector.broadcast %431 : vector<1x128xf32> to vector<16x128xf32>
    %433 = arith.mulf %428, %432 : vector<16x128xf32>
    %434 = arith.addf %426, %433 : vector<16x128xf32>
    %435 = vector.broadcast %41 : vector<1x128xf32> to vector<16x128xf32>
    %436 = arith.addf %434, %435 : vector<16x128xf32>
    %cst_214 = arith.constant 0.000000e+00 : f32
    %cst_215 = arith.constant 6.000000e+00 : f32
    %437 = vector.broadcast %cst_214 : f32 to vector<16x128xf32>
    %438 = arith.maximumf %437, %436 : vector<16x128xf32>
    %439 = vector.broadcast %cst_215 : f32 to vector<16x128xf32>
    %440 = arith.minimumf %439, %438 : vector<16x128xf32>
    %c64 = arith.constant 64 : index
    %c0_216 = arith.constant 0 : index
    %441 = vector.load %arg11[%c64, %c0_216] : memref<128x128xf32, #tpu.memory_space<vmem>>, vector<16x128xf32>
    tpu.vector_store %arg11[%c64, %c0_216], %440 {strides = array<i32>} : memref<128x128xf32, #tpu.memory_space<vmem>>, vector<16x128xf32>,
    %cst_217 = arith.constant 0.000000e+00 : f32
    %442 = vector.broadcast %cst_217 : f32 to vector<16x128xf32>
    %c5_218 = arith.constant 5 : index
    %c0_219 = arith.constant 0 : index
    %c0_220 = arith.constant 0 : index
    %c0_221 = arith.constant 0 : index
    %443 = vector.load %arg10[%c5_218, %c0_219, %c0_220, %c0_221] : memref<10x1x24x128xf32, #tpu.memory_space<vmem>>, vector<1x1x16x128xf32>
    %444 = vector.shape_cast %443 : vector<1x1x16x128xf32> to vector<16x128xf32>
    %445 = vector.extract_strided_slice %40 {offsets = [0, 0, 0], sizes = [1, 1, 128], strides = [1, 1, 1]} : vector<3x3x128xf32> to vector<1x1x128xf32>
    %446 = vector.shape_cast %445 : vector<1x1x128xf32> to vector<128xf32>
    %447 = vector.shape_cast %446 : vector<128xf32> to vector<1x128xf32>
    %448 = vector.broadcast %447 : vector<1x128xf32> to vector<16x128xf32>
    %449 = arith.mulf %444, %448 : vector<16x128xf32>
    %450 = arith.addf %442, %449 : vector<16x128xf32>
    %c5_222 = arith.constant 5 : index
    %c0_223 = arith.constant 0 : index
    %c1_224 = arith.constant 1 : index
    %c0_225 = arith.constant 0 : index
    %451 = vector.load %arg10[%c5_222, %c0_223, %c1_224, %c0_225] : memref<10x1x24x128xf32, #tpu.memory_space<vmem>>, vector<1x1x16x128xf32>
    %452 = vector.shape_cast %451 : vector<1x1x16x128xf32> to vector<16x128xf32>
    %453 = vector.extract_strided_slice %40 {offsets = [0, 1, 0], sizes = [1, 1, 128], strides = [1, 1, 1]} : vector<3x3x128xf32> to vector<1x1x128xf32>
    %454 = vector.shape_cast %453 : vector<1x1x128xf32> to vector<128xf32>
    %455 = vector.shape_cast %454 : vector<128xf32> to vector<1x128xf32>
    %456 = vector.broadcast %455 : vector<1x128xf32> to vector<16x128xf32>
    %457 = arith.mulf %452, %456 : vector<16x128xf32>
    %458 = arith.addf %450, %457 : vector<16x128xf32>
    %c5_226 = arith.constant 5 : index
    %c0_227 = arith.constant 0 : index
    %c2_228 = arith.constant 2 : index
    %c0_229 = arith.constant 0 : index
    %459 = vector.load %arg10[%c5_226, %c0_227, %c2_228, %c0_229] : memref<10x1x24x128xf32, #tpu.memory_space<vmem>>, vector<1x1x16x128xf32>
    %460 = vector.shape_cast %459 : vector<1x1x16x128xf32> to vector<16x128xf32>
    %461 = vector.extract_strided_slice %40 {offsets = [0, 2, 0], sizes = [1, 1, 128], strides = [1, 1, 1]} : vector<3x3x128xf32> to vector<1x1x128xf32>
    %462 = vector.shape_cast %461 : vector<1x1x128xf32> to vector<128xf32>
    %463 = vector.shape_cast %462 : vector<128xf32> to vector<1x128xf32>
    %464 = vector.broadcast %463 : vector<1x128xf32> to vector<16x128xf32>
    %465 = arith.mulf %460, %464 : vector<16x128xf32>
    %466 = arith.addf %458, %465 : vector<16x128xf32>
    %c6_230 = arith.constant 6 : index
    %c0_231 = arith.constant 0 : index
    %c0_232 = arith.constant 0 : index
    %c0_233 = arith.constant 0 : index
    %467 = vector.load %arg10[%c6_230, %c0_231, %c0_232, %c0_233] : memref<10x1x24x128xf32, #tpu.memory_space<vmem>>, vector<1x1x16x128xf32>
    %468 = vector.shape_cast %467 : vector<1x1x16x128xf32> to vector<16x128xf32>
    %469 = vector.extract_strided_slice %40 {offsets = [1, 0, 0], sizes = [1, 1, 128], strides = [1, 1, 1]} : vector<3x3x128xf32> to vector<1x1x128xf32>
    %470 = vector.shape_cast %469 : vector<1x1x128xf32> to vector<128xf32>
    %471 = vector.shape_cast %470 : vector<128xf32> to vector<1x128xf32>
    %472 = vector.broadcast %471 : vector<1x128xf32> to vector<16x128xf32>
    %473 = arith.mulf %468, %472 : vector<16x128xf32>
    %474 = arith.addf %466, %473 : vector<16x128xf32>
    %c6_234 = arith.constant 6 : index
    %c0_235 = arith.constant 0 : index
    %c1_236 = arith.constant 1 : index
    %c0_237 = arith.constant 0 : index
    %475 = vector.load %arg10[%c6_234, %c0_235, %c1_236, %c0_237] : memref<10x1x24x128xf32, #tpu.memory_space<vmem>>, vector<1x1x16x128xf32>
    %476 = vector.shape_cast %475 : vector<1x1x16x128xf32> to vector<16x128xf32>
    %477 = vector.extract_strided_slice %40 {offsets = [1, 1, 0], sizes = [1, 1, 128], strides = [1, 1, 1]} : vector<3x3x128xf32> to vector<1x1x128xf32>
    %478 = vector.shape_cast %477 : vector<1x1x128xf32> to vector<128xf32>
    %479 = vector.shape_cast %478 : vector<128xf32> to vector<1x128xf32>
    %480 = vector.broadcast %479 : vector<1x128xf32> to vector<16x128xf32>
    %481 = arith.mulf %476, %480 : vector<16x128xf32>
    %482 = arith.addf %474, %481 : vector<16x128xf32>
    %c6_238 = arith.constant 6 : index
    %c0_239 = arith.constant 0 : index
    %c2_240 = arith.constant 2 : index
    %c0_241 = arith.constant 0 : index
    %483 = vector.load %arg10[%c6_238, %c0_239, %c2_240, %c0_241] : memref<10x1x24x128xf32, #tpu.memory_space<vmem>>, vector<1x1x16x128xf32>
    %484 = vector.shape_cast %483 : vector<1x1x16x128xf32> to vector<16x128xf32>
    %485 = vector.extract_strided_slice %40 {offsets = [1, 2, 0], sizes = [1, 1, 128], strides = [1, 1, 1]} : vector<3x3x128xf32> to vector<1x1x128xf32>
    %486 = vector.shape_cast %485 : vector<1x1x128xf32> to vector<128xf32>
    %487 = vector.shape_cast %486 : vector<128xf32> to vector<1x128xf32>
    %488 = vector.broadcast %487 : vector<1x128xf32> to vector<16x128xf32>
    %489 = arith.mulf %484, %488 : vector<16x128xf32>
    %490 = arith.addf %482, %489 : vector<16x128xf32>
    %c7 = arith.constant 7 : index
    %c0_242 = arith.constant 0 : index
    %c0_243 = arith.constant 0 : index
    %c0_244 = arith.constant 0 : index
    %491 = vector.load %arg10[%c7, %c0_242, %c0_243, %c0_244] : memref<10x1x24x128xf32, #tpu.memory_space<vmem>>, vector<1x1x16x128xf32>
    %492 = vector.shape_cast %491 : vector<1x1x16x128xf32> to vector<16x128xf32>
    %493 = vector.extract_strided_slice %40 {offsets = [2, 0, 0], sizes = [1, 1, 128], strides = [1, 1, 1]} : vector<3x3x128xf32> to vector<1x1x128xf32>
    %494 = vector.shape_cast %493 : vector<1x1x128xf32> to vector<128xf32>
    %495 = vector.shape_cast %494 : vector<128xf32> to vector<1x128xf32>
    %496 = vector.broadcast %495 : vector<1x128xf32> to vector<16x128xf32>
    %497 = arith.mulf %492, %496 : vector<16x128xf32>
    %498 = arith.addf %490, %497 : vector<16x128xf32>
    %c7_245 = arith.constant 7 : index
    %c0_246 = arith.constant 0 : index
    %c1_247 = arith.constant 1 : index
    %c0_248 = arith.constant 0 : index
    %499 = vector.load %arg10[%c7_245, %c0_246, %c1_247, %c0_248] : memref<10x1x24x128xf32, #tpu.memory_space<vmem>>, vector<1x1x16x128xf32>
    %500 = vector.shape_cast %499 : vector<1x1x16x128xf32> to vector<16x128xf32>
    %501 = vector.extract_strided_slice %40 {offsets = [2, 1, 0], sizes = [1, 1, 128], strides = [1, 1, 1]} : vector<3x3x128xf32> to vector<1x1x128xf32>
    %502 = vector.shape_cast %501 : vector<1x1x128xf32> to vector<128xf32>
    %503 = vector.shape_cast %502 : vector<128xf32> to vector<1x128xf32>
    %504 = vector.broadcast %503 : vector<1x128xf32> to vector<16x128xf32>
    %505 = arith.mulf %500, %504 : vector<16x128xf32>
    %506 = arith.addf %498, %505 : vector<16x128xf32>
    %c7_249 = arith.constant 7 : index
    %c0_250 = arith.constant 0 : index
    %c2_251 = arith.constant 2 : index
    %c0_252 = arith.constant 0 : index
    %507 = vector.load %arg10[%c7_249, %c0_250, %c2_251, %c0_252] : memref<10x1x24x128xf32, #tpu.memory_space<vmem>>, vector<1x1x16x128xf32>
    %508 = vector.shape_cast %507 : vector<1x1x16x128xf32> to vector<16x128xf32>
    %509 = vector.extract_strided_slice %40 {offsets = [2, 2, 0], sizes = [1, 1, 128], strides = [1, 1, 1]} : vector<3x3x128xf32> to vector<1x1x128xf32>
    %510 = vector.shape_cast %509 : vector<1x1x128xf32> to vector<128xf32>
    %511 = vector.shape_cast %510 : vector<128xf32> to vector<1x128xf32>
    %512 = vector.broadcast %511 : vector<1x128xf32> to vector<16x128xf32>
    %513 = arith.mulf %508, %512 : vector<16x128xf32>
    %514 = arith.addf %506, %513 : vector<16x128xf32>
    %515 = vector.broadcast %41 : vector<1x128xf32> to vector<16x128xf32>
    %516 = arith.addf %514, %515 : vector<16x128xf32>
    %cst_253 = arith.constant 0.000000e+00 : f32
    %cst_254 = arith.constant 6.000000e+00 : f32
    %517 = vector.broadcast %cst_253 : f32 to vector<16x128xf32>
    %518 = arith.maximumf %517, %516 : vector<16x128xf32>
    %519 = vector.broadcast %cst_254 : f32 to vector<16x128xf32>
    %520 = arith.minimumf %519, %518 : vector<16x128xf32>
    %c80 = arith.constant 80 : index
    %c0_255 = arith.constant 0 : index
    %521 = vector.load %arg11[%c80, %c0_255] : memref<128x128xf32, #tpu.memory_space<vmem>>, vector<16x128xf32>
    tpu.vector_store %arg11[%c80, %c0_255], %520 {strides = array<i32>} : memref<128x128xf32, #tpu.memory_space<vmem>>, vector<16x128xf32>,
    %cst_256 = arith.constant 0.000000e+00 : f32
    %522 = vector.broadcast %cst_256 : f32 to vector<16x128xf32>
    %c6_257 = arith.constant 6 : index
    %c0_258 = arith.constant 0 : index
    %c0_259 = arith.constant 0 : index
    %c0_260 = arith.constant 0 : index
    %523 = vector.load %arg10[%c6_257, %c0_258, %c0_259, %c0_260] : memref<10x1x24x128xf32, #tpu.memory_space<vmem>>, vector<1x1x16x128xf32>
    %524 = vector.shape_cast %523 : vector<1x1x16x128xf32> to vector<16x128xf32>
    %525 = vector.extract_strided_slice %40 {offsets = [0, 0, 0], sizes = [1, 1, 128], strides = [1, 1, 1]} : vector<3x3x128xf32> to vector<1x1x128xf32>
    %526 = vector.shape_cast %525 : vector<1x1x128xf32> to vector<128xf32>
    %527 = vector.shape_cast %526 : vector<128xf32> to vector<1x128xf32>
    %528 = vector.broadcast %527 : vector<1x128xf32> to vector<16x128xf32>
    %529 = arith.mulf %524, %528 : vector<16x128xf32>
    %530 = arith.addf %522, %529 : vector<16x128xf32>
    %c6_261 = arith.constant 6 : index
    %c0_262 = arith.constant 0 : index
    %c1_263 = arith.constant 1 : index
    %c0_264 = arith.constant 0 : index
    %531 = vector.load %arg10[%c6_261, %c0_262, %c1_263, %c0_264] : memref<10x1x24x128xf32, #tpu.memory_space<vmem>>, vector<1x1x16x128xf32>
    %532 = vector.shape_cast %531 : vector<1x1x16x128xf32> to vector<16x128xf32>
    %533 = vector.extract_strided_slice %40 {offsets = [0, 1, 0], sizes = [1, 1, 128], strides = [1, 1, 1]} : vector<3x3x128xf32> to vector<1x1x128xf32>
    %534 = vector.shape_cast %533 : vector<1x1x128xf32> to vector<128xf32>
    %535 = vector.shape_cast %534 : vector<128xf32> to vector<1x128xf32>
    %536 = vector.broadcast %535 : vector<1x128xf32> to vector<16x128xf32>
    %537 = arith.mulf %532, %536 : vector<16x128xf32>
    %538 = arith.addf %530, %537 : vector<16x128xf32>
    %c6_265 = arith.constant 6 : index
    %c0_266 = arith.constant 0 : index
    %c2_267 = arith.constant 2 : index
    %c0_268 = arith.constant 0 : index
    %539 = vector.load %arg10[%c6_265, %c0_266, %c2_267, %c0_268] : memref<10x1x24x128xf32, #tpu.memory_space<vmem>>, vector<1x1x16x128xf32>
    %540 = vector.shape_cast %539 : vector<1x1x16x128xf32> to vector<16x128xf32>
    %541 = vector.extract_strided_slice %40 {offsets = [0, 2, 0], sizes = [1, 1, 128], strides = [1, 1, 1]} : vector<3x3x128xf32> to vector<1x1x128xf32>
    %542 = vector.shape_cast %541 : vector<1x1x128xf32> to vector<128xf32>
    %543 = vector.shape_cast %542 : vector<128xf32> to vector<1x128xf32>
    %544 = vector.broadcast %543 : vector<1x128xf32> to vector<16x128xf32>
    %545 = arith.mulf %540, %544 : vector<16x128xf32>
    %546 = arith.addf %538, %545 : vector<16x128xf32>
    %c7_269 = arith.constant 7 : index
    %c0_270 = arith.constant 0 : index
    %c0_271 = arith.constant 0 : index
    %c0_272 = arith.constant 0 : index
    %547 = vector.load %arg10[%c7_269, %c0_270, %c0_271, %c0_272] : memref<10x1x24x128xf32, #tpu.memory_space<vmem>>, vector<1x1x16x128xf32>
    %548 = vector.shape_cast %547 : vector<1x1x16x128xf32> to vector<16x128xf32>
    %549 = vector.extract_strided_slice %40 {offsets = [1, 0, 0], sizes = [1, 1, 128], strides = [1, 1, 1]} : vector<3x3x128xf32> to vector<1x1x128xf32>
    %550 = vector.shape_cast %549 : vector<1x1x128xf32> to vector<128xf32>
    %551 = vector.shape_cast %550 : vector<128xf32> to vector<1x128xf32>
    %552 = vector.broadcast %551 : vector<1x128xf32> to vector<16x128xf32>
    %553 = arith.mulf %548, %552 : vector<16x128xf32>
    %554 = arith.addf %546, %553 : vector<16x128xf32>
    %c7_273 = arith.constant 7 : index
    %c0_274 = arith.constant 0 : index
    %c1_275 = arith.constant 1 : index
    %c0_276 = arith.constant 0 : index
    %555 = vector.load %arg10[%c7_273, %c0_274, %c1_275, %c0_276] : memref<10x1x24x128xf32, #tpu.memory_space<vmem>>, vector<1x1x16x128xf32>
    %556 = vector.shape_cast %555 : vector<1x1x16x128xf32> to vector<16x128xf32>
    %557 = vector.extract_strided_slice %40 {offsets = [1, 1, 0], sizes = [1, 1, 128], strides = [1, 1, 1]} : vector<3x3x128xf32> to vector<1x1x128xf32>
    %558 = vector.shape_cast %557 : vector<1x1x128xf32> to vector<128xf32>
    %559 = vector.shape_cast %558 : vector<128xf32> to vector<1x128xf32>
    %560 = vector.broadcast %559 : vector<1x128xf32> to vector<16x128xf32>
    %561 = arith.mulf %556, %560 : vector<16x128xf32>
    %562 = arith.addf %554, %561 : vector<16x128xf32>
    %c7_277 = arith.constant 7 : index
    %c0_278 = arith.constant 0 : index
    %c2_279 = arith.constant 2 : index
    %c0_280 = arith.constant 0 : index
    %563 = vector.load %arg10[%c7_277, %c0_278, %c2_279, %c0_280] : memref<10x1x24x128xf32, #tpu.memory_space<vmem>>, vector<1x1x16x128xf32>
    %564 = vector.shape_cast %563 : vector<1x1x16x128xf32> to vector<16x128xf32>
    %565 = vector.extract_strided_slice %40 {offsets = [1, 2, 0], sizes = [1, 1, 128], strides = [1, 1, 1]} : vector<3x3x128xf32> to vector<1x1x128xf32>
    %566 = vector.shape_cast %565 : vector<1x1x128xf32> to vector<128xf32>
    %567 = vector.shape_cast %566 : vector<128xf32> to vector<1x128xf32>
    %568 = vector.broadcast %567 : vector<1x128xf32> to vector<16x128xf32>
    %569 = arith.mulf %564, %568 : vector<16x128xf32>
    %570 = arith.addf %562, %569 : vector<16x128xf32>
    %c8 = arith.constant 8 : index
    %c0_281 = arith.constant 0 : index
    %c0_282 = arith.constant 0 : index
    %c0_283 = arith.constant 0 : index
    %571 = vector.load %arg10[%c8, %c0_281, %c0_282, %c0_283] : memref<10x1x24x128xf32, #tpu.memory_space<vmem>>, vector<1x1x16x128xf32>
    %572 = vector.shape_cast %571 : vector<1x1x16x128xf32> to vector<16x128xf32>
    %573 = vector.extract_strided_slice %40 {offsets = [2, 0, 0], sizes = [1, 1, 128], strides = [1, 1, 1]} : vector<3x3x128xf32> to vector<1x1x128xf32>
    %574 = vector.shape_cast %573 : vector<1x1x128xf32> to vector<128xf32>
    %575 = vector.shape_cast %574 : vector<128xf32> to vector<1x128xf32>
    %576 = vector.broadcast %575 : vector<1x128xf32> to vector<16x128xf32>
    %577 = arith.mulf %572, %576 : vector<16x128xf32>
    %578 = arith.addf %570, %577 : vector<16x128xf32>
    %c8_284 = arith.constant 8 : index
    %c0_285 = arith.constant 0 : index
    %c1_286 = arith.constant 1 : index
    %c0_287 = arith.constant 0 : index
    %579 = vector.load %arg10[%c8_284, %c0_285, %c1_286, %c0_287] : memref<10x1x24x128xf32, #tpu.memory_space<vmem>>, vector<1x1x16x128xf32>
    %580 = vector.shape_cast %579 : vector<1x1x16x128xf32> to vector<16x128xf32>
    %581 = vector.extract_strided_slice %40 {offsets = [2, 1, 0], sizes = [1, 1, 128], strides = [1, 1, 1]} : vector<3x3x128xf32> to vector<1x1x128xf32>
    %582 = vector.shape_cast %581 : vector<1x1x128xf32> to vector<128xf32>
    %583 = vector.shape_cast %582 : vector<128xf32> to vector<1x128xf32>
    %584 = vector.broadcast %583 : vector<1x128xf32> to vector<16x128xf32>
    %585 = arith.mulf %580, %584 : vector<16x128xf32>
    %586 = arith.addf %578, %585 : vector<16x128xf32>
    %c8_288 = arith.constant 8 : index
    %c0_289 = arith.constant 0 : index
    %c2_290 = arith.constant 2 : index
    %c0_291 = arith.constant 0 : index
    %587 = vector.load %arg10[%c8_288, %c0_289, %c2_290, %c0_291] : memref<10x1x24x128xf32, #tpu.memory_space<vmem>>, vector<1x1x16x128xf32>
    %588 = vector.shape_cast %587 : vector<1x1x16x128xf32> to vector<16x128xf32>
    %589 = vector.extract_strided_slice %40 {offsets = [2, 2, 0], sizes = [1, 1, 128], strides = [1, 1, 1]} : vector<3x3x128xf32> to vector<1x1x128xf32>
    %590 = vector.shape_cast %589 : vector<1x1x128xf32> to vector<128xf32>
    %591 = vector.shape_cast %590 : vector<128xf32> to vector<1x128xf32>
    %592 = vector.broadcast %591 : vector<1x128xf32> to vector<16x128xf32>
    %593 = arith.mulf %588, %592 : vector<16x128xf32>
    %594 = arith.addf %586, %593 : vector<16x128xf32>
    %595 = vector.broadcast %41 : vector<1x128xf32> to vector<16x128xf32>
    %596 = arith.addf %594, %595 : vector<16x128xf32>
    %cst_292 = arith.constant 0.000000e+00 : f32
    %cst_293 = arith.constant 6.000000e+00 : f32
    %597 = vector.broadcast %cst_292 : f32 to vector<16x128xf32>
    %598 = arith.maximumf %597, %596 : vector<16x128xf32>
    %599 = vector.broadcast %cst_293 : f32 to vector<16x128xf32>
    %600 = arith.minimumf %599, %598 : vector<16x128xf32>
    %c96 = arith.constant 96 : index
    %c0_294 = arith.constant 0 : index
    %601 = vector.load %arg11[%c96, %c0_294] : memref<128x128xf32, #tpu.memory_space<vmem>>, vector<16x128xf32>
    tpu.vector_store %arg11[%c96, %c0_294], %600 {strides = array<i32>} : memref<128x128xf32, #tpu.memory_space<vmem>>, vector<16x128xf32>,
    %cst_295 = arith.constant 0.000000e+00 : f32
    %602 = vector.broadcast %cst_295 : f32 to vector<16x128xf32>
    %c7_296 = arith.constant 7 : index
    %c0_297 = arith.constant 0 : index
    %c0_298 = arith.constant 0 : index
    %c0_299 = arith.constant 0 : index
    %603 = vector.load %arg10[%c7_296, %c0_297, %c0_298, %c0_299] : memref<10x1x24x128xf32, #tpu.memory_space<vmem>>, vector<1x1x16x128xf32>
    %604 = vector.shape_cast %603 : vector<1x1x16x128xf32> to vector<16x128xf32>
    %605 = vector.extract_strided_slice %40 {offsets = [0, 0, 0], sizes = [1, 1, 128], strides = [1, 1, 1]} : vector<3x3x128xf32> to vector<1x1x128xf32>
    %606 = vector.shape_cast %605 : vector<1x1x128xf32> to vector<128xf32>
    %607 = vector.shape_cast %606 : vector<128xf32> to vector<1x128xf32>
    %608 = vector.broadcast %607 : vector<1x128xf32> to vector<16x128xf32>
    %609 = arith.mulf %604, %608 : vector<16x128xf32>
    %610 = arith.addf %602, %609 : vector<16x128xf32>
    %c7_300 = arith.constant 7 : index
    %c0_301 = arith.constant 0 : index
    %c1_302 = arith.constant 1 : index
    %c0_303 = arith.constant 0 : index
    %611 = vector.load %arg10[%c7_300, %c0_301, %c1_302, %c0_303] : memref<10x1x24x128xf32, #tpu.memory_space<vmem>>, vector<1x1x16x128xf32>
    %612 = vector.shape_cast %611 : vector<1x1x16x128xf32> to vector<16x128xf32>
    %613 = vector.extract_strided_slice %40 {offsets = [0, 1, 0], sizes = [1, 1, 128], strides = [1, 1, 1]} : vector<3x3x128xf32> to vector<1x1x128xf32>
    %614 = vector.shape_cast %613 : vector<1x1x128xf32> to vector<128xf32>
    %615 = vector.shape_cast %614 : vector<128xf32> to vector<1x128xf32>
    %616 = vector.broadcast %615 : vector<1x128xf32> to vector<16x128xf32>
    %617 = arith.mulf %612, %616 : vector<16x128xf32>
    %618 = arith.addf %610, %617 : vector<16x128xf32>
    %c7_304 = arith.constant 7 : index
    %c0_305 = arith.constant 0 : index
    %c2_306 = arith.constant 2 : index
    %c0_307 = arith.constant 0 : index
    %619 = vector.load %arg10[%c7_304, %c0_305, %c2_306, %c0_307] : memref<10x1x24x128xf32, #tpu.memory_space<vmem>>, vector<1x1x16x128xf32>
    %620 = vector.shape_cast %619 : vector<1x1x16x128xf32> to vector<16x128xf32>
    %621 = vector.extract_strided_slice %40 {offsets = [0, 2, 0], sizes = [1, 1, 128], strides = [1, 1, 1]} : vector<3x3x128xf32> to vector<1x1x128xf32>
    %622 = vector.shape_cast %621 : vector<1x1x128xf32> to vector<128xf32>
    %623 = vector.shape_cast %622 : vector<128xf32> to vector<1x128xf32>
    %624 = vector.broadcast %623 : vector<1x128xf32> to vector<16x128xf32>
    %625 = arith.mulf %620, %624 : vector<16x128xf32>
    %626 = arith.addf %618, %625 : vector<16x128xf32>
    %c8_308 = arith.constant 8 : index
    %c0_309 = arith.constant 0 : index
    %c0_310 = arith.constant 0 : index
    %c0_311 = arith.constant 0 : index
    %627 = vector.load %arg10[%c8_308, %c0_309, %c0_310, %c0_311] : memref<10x1x24x128xf32, #tpu.memory_space<vmem>>, vector<1x1x16x128xf32>
    %628 = vector.shape_cast %627 : vector<1x1x16x128xf32> to vector<16x128xf32>
    %629 = vector.extract_strided_slice %40 {offsets = [1, 0, 0], sizes = [1, 1, 128], strides = [1, 1, 1]} : vector<3x3x128xf32> to vector<1x1x128xf32>
    %630 = vector.shape_cast %629 : vector<1x1x128xf32> to vector<128xf32>
    %631 = vector.shape_cast %630 : vector<128xf32> to vector<1x128xf32>
    %632 = vector.broadcast %631 : vector<1x128xf32> to vector<16x128xf32>
    %633 = arith.mulf %628, %632 : vector<16x128xf32>
    %634 = arith.addf %626, %633 : vector<16x128xf32>
    %c8_312 = arith.constant 8 : index
    %c0_313 = arith.constant 0 : index
    %c1_314 = arith.constant 1 : index
    %c0_315 = arith.constant 0 : index
    %635 = vector.load %arg10[%c8_312, %c0_313, %c1_314, %c0_315] : memref<10x1x24x128xf32, #tpu.memory_space<vmem>>, vector<1x1x16x128xf32>
    %636 = vector.shape_cast %635 : vector<1x1x16x128xf32> to vector<16x128xf32>
    %637 = vector.extract_strided_slice %40 {offsets = [1, 1, 0], sizes = [1, 1, 128], strides = [1, 1, 1]} : vector<3x3x128xf32> to vector<1x1x128xf32>
    %638 = vector.shape_cast %637 : vector<1x1x128xf32> to vector<128xf32>
    %639 = vector.shape_cast %638 : vector<128xf32> to vector<1x128xf32>
    %640 = vector.broadcast %639 : vector<1x128xf32> to vector<16x128xf32>
    %641 = arith.mulf %636, %640 : vector<16x128xf32>
    %642 = arith.addf %634, %641 : vector<16x128xf32>
    %c8_316 = arith.constant 8 : index
    %c0_317 = arith.constant 0 : index
    %c2_318 = arith.constant 2 : index
    %c0_319 = arith.constant 0 : index
    %643 = vector.load %arg10[%c8_316, %c0_317, %c2_318, %c0_319] : memref<10x1x24x128xf32, #tpu.memory_space<vmem>>, vector<1x1x16x128xf32>
    %644 = vector.shape_cast %643 : vector<1x1x16x128xf32> to vector<16x128xf32>
    %645 = vector.extract_strided_slice %40 {offsets = [1, 2, 0], sizes = [1, 1, 128], strides = [1, 1, 1]} : vector<3x3x128xf32> to vector<1x1x128xf32>
    %646 = vector.shape_cast %645 : vector<1x1x128xf32> to vector<128xf32>
    %647 = vector.shape_cast %646 : vector<128xf32> to vector<1x128xf32>
    %648 = vector.broadcast %647 : vector<1x128xf32> to vector<16x128xf32>
    %649 = arith.mulf %644, %648 : vector<16x128xf32>
    %650 = arith.addf %642, %649 : vector<16x128xf32>
    %c9 = arith.constant 9 : index
    %c0_320 = arith.constant 0 : index
    %c0_321 = arith.constant 0 : index
    %c0_322 = arith.constant 0 : index
    %651 = vector.load %arg10[%c9, %c0_320, %c0_321, %c0_322] : memref<10x1x24x128xf32, #tpu.memory_space<vmem>>, vector<1x1x16x128xf32>
    %652 = vector.shape_cast %651 : vector<1x1x16x128xf32> to vector<16x128xf32>
    %653 = vector.extract_strided_slice %40 {offsets = [2, 0, 0], sizes = [1, 1, 128], strides = [1, 1, 1]} : vector<3x3x128xf32> to vector<1x1x128xf32>
    %654 = vector.shape_cast %653 : vector<1x1x128xf32> to vector<128xf32>
    %655 = vector.shape_cast %654 : vector<128xf32> to vector<1x128xf32>
    %656 = vector.broadcast %655 : vector<1x128xf32> to vector<16x128xf32>
    %657 = arith.mulf %652, %656 : vector<16x128xf32>
    %658 = arith.addf %650, %657 : vector<16x128xf32>
    %c9_323 = arith.constant 9 : index
    %c0_324 = arith.constant 0 : index
    %c1_325 = arith.constant 1 : index
    %c0_326 = arith.constant 0 : index
    %659 = vector.load %arg10[%c9_323, %c0_324, %c1_325, %c0_326] : memref<10x1x24x128xf32, #tpu.memory_space<vmem>>, vector<1x1x16x128xf32>
    %660 = vector.shape_cast %659 : vector<1x1x16x128xf32> to vector<16x128xf32>
    %661 = vector.extract_strided_slice %40 {offsets = [2, 1, 0], sizes = [1, 1, 128], strides = [1, 1, 1]} : vector<3x3x128xf32> to vector<1x1x128xf32>
    %662 = vector.shape_cast %661 : vector<1x1x128xf32> to vector<128xf32>
    %663 = vector.shape_cast %662 : vector<128xf32> to vector<1x128xf32>
    %664 = vector.broadcast %663 : vector<1x128xf32> to vector<16x128xf32>
    %665 = arith.mulf %660, %664 : vector<16x128xf32>
    %666 = arith.addf %658, %665 : vector<16x128xf32>
    %c9_327 = arith.constant 9 : index
    %c0_328 = arith.constant 0 : index
    %c2_329 = arith.constant 2 : index
    %c0_330 = arith.constant 0 : index
    %667 = vector.load %arg10[%c9_327, %c0_328, %c2_329, %c0_330] : memref<10x1x24x128xf32, #tpu.memory_space<vmem>>, vector<1x1x16x128xf32>
    %668 = vector.shape_cast %667 : vector<1x1x16x128xf32> to vector<16x128xf32>
    %669 = vector.extract_strided_slice %40 {offsets = [2, 2, 0], sizes = [1, 1, 128], strides = [1, 1, 1]} : vector<3x3x128xf32> to vector<1x1x128xf32>
    %670 = vector.shape_cast %669 : vector<1x1x128xf32> to vector<128xf32>
    %671 = vector.shape_cast %670 : vector<128xf32> to vector<1x128xf32>
    %672 = vector.broadcast %671 : vector<1x128xf32> to vector<16x128xf32>
    %673 = arith.mulf %668, %672 : vector<16x128xf32>
    %674 = arith.addf %666, %673 : vector<16x128xf32>
    %675 = vector.broadcast %41 : vector<1x128xf32> to vector<16x128xf32>
    %676 = arith.addf %674, %675 : vector<16x128xf32>
    %cst_331 = arith.constant 0.000000e+00 : f32
    %cst_332 = arith.constant 6.000000e+00 : f32
    %677 = vector.broadcast %cst_331 : f32 to vector<16x128xf32>
    %678 = arith.maximumf %677, %676 : vector<16x128xf32>
    %679 = vector.broadcast %cst_332 : f32 to vector<16x128xf32>
    %680 = arith.minimumf %679, %678 : vector<16x128xf32>
    %c112 = arith.constant 112 : index
    %c0_333 = arith.constant 0 : index
    %681 = vector.load %arg11[%c112, %c0_333] : memref<128x128xf32, #tpu.memory_space<vmem>>, vector<16x128xf32>
    tpu.vector_store %arg11[%c112, %c0_333], %680 {strides = array<i32>} : memref<128x128xf32, #tpu.memory_space<vmem>>, vector<16x128xf32>,
    %c0_334 = arith.constant 0 : index
    %c0_335 = arith.constant 0 : index
    %682 = vector.load %arg11[%c0_334, %c0_335] : memref<128x128xf32, #tpu.memory_space<vmem>>, vector<128x128xf32>
    %c0_336 = arith.constant 0 : index
    %c0_337 = arith.constant 0 : index
    %683 = vector.load %arg7[%c0_336, %c0_337] : memref<128x4xf32, #tpu.memory_space<vmem>>, vector<128x4xf32>
    %cst_338 = arith.constant dense<0.000000e+00> : vector<128x4xf32>
    %684 = tpu.matmul %682, %683, %cst_338 {dimension_numbers = #tpu.dot_dimension_numbers<[1], [0], [0], [1], [0, 0, 1, 1], [], []>} : vector<128x128xf32>, vector<128x4xf32>, vector<128x4xf32> -> vector<128x4xf32>
    %c0_339 = arith.constant 0 : index
    %c0_340 = arith.constant 0 : index
    %685 = vector.load %arg8[%c0_339, %c0_340] : memref<1x4xf32, #tpu.memory_space<vmem>>, vector<1x4xf32>
    %686 = vector.broadcast %685 : vector<1x4xf32> to vector<128x4xf32>
    %687 = arith.addf %684, %686 : vector<128x4xf32>
    %688 = vector.shape_cast %687 : vector<128x4xf32> to vector<8x16x4xf32>
    %c1_i32_341 = arith.constant 1 : i32
    %689 = arith.addi %1, %c1_i32_341 : i32
    %c0_342 = arith.constant 0 : index
    %690 = arith.index_cast %689 : i32 to index
    %c0_343 = arith.constant 0 : index
    %c1_344 = arith.constant 1 : index
    %c0_345 = arith.constant 0 : index
    %691 = vector.load %arg2[%c0_342, %690, %c0_343, %c1_344, %c0_345] : memref<1x18x1x24x4xf32, #tpu.memory_space<vmem>>, vector<1x8x1x16x4xf32>
    %692 = vector.shape_cast %691 : vector<1x8x1x16x4xf32> to vector<8x16x4xf32>
    %693 = arith.addf %688, %692 : vector<8x16x4xf32>
    %c0_346 = arith.constant 0 : index
    %c0_347 = arith.constant 0 : index
    %c0_348 = arith.constant 0 : index
    %c0_349 = arith.constant 0 : index
    %694 = vector.load %arg9[%c0_346, %c0_347, %c0_348, %c0_349] : memref<1x8x16x4xf32, #tpu.memory_space<vmem>>, vector<1x8x16x4xf32>
    %695 = vector.shape_cast %694 : vector<1x8x16x4xf32> to vector<8x16x4xf32>
    %696 = vector.shape_cast %693 : vector<8x16x4xf32> to vector<1x8x16x4xf32>
    tpu.vector_store %arg9[%c0_346, %c0_347, %c0_348, %c0_349], %696 {strides = array<i32>} : memref<1x8x16x4xf32, #tpu.memory_space<vmem>>, vector<1x8x16x4xf32>,
    return
  }
  func.func @transform_0(%arg0: i32, %arg1: i32) -> (i32, i32, i32, i32, i32) {
    %c0_i32 = arith.constant 0 : i32
    %c0_i32_0 = arith.constant 0 : i32
    %c0_i32_1 = arith.constant 0 : i32
    %c0_i32_2 = arith.constant 0 : i32
    %c0_i32_3 = arith.constant 0 : i32
    return %arg0, %c0_i32, %c0_i32_0, %c0_i32_1, %c0_i32_2 : i32, i32, i32, i32, i32
  }
  func.func @transform_1(%arg0: i32, %arg1: i32) -> (i32, i32) {
    %c0_i32 = arith.constant 0 : i32
    %c0_i32_0 = arith.constant 0 : i32
    %c0_i32_1 = arith.constant 0 : i32
    return %c0_i32, %c0_i32_0 : i32, i32
  }
  func.func @transform_2(%arg0: i32, %arg1: i32) -> (i32, i32) {
    %c0_i32 = arith.constant 0 : i32
    %c0_i32_0 = arith.constant 0 : i32
    %c0_i32_1 = arith.constant 0 : i32
    return %c0_i32, %c0_i32_0 : i32, i32
  }
  func.func @transform_3(%arg0: i32, %arg1: i32) -> (i32, i32, i32) {
    %c0_i32 = arith.constant 0 : i32
    %c0_i32_0 = arith.constant 0 : i32
    %c0_i32_1 = arith.constant 0 : i32
    %c0_i32_2 = arith.constant 0 : i32
    return %c0_i32, %c0_i32_0, %c0_i32_1 : i32, i32, i32
  }
  func.func @transform_4(%arg0: i32, %arg1: i32) -> (i32, i32) {
    %c0_i32 = arith.constant 0 : i32
    %c0_i32_0 = arith.constant 0 : i32
    %c0_i32_1 = arith.constant 0 : i32
    return %c0_i32, %c0_i32_0 : i32, i32
  }
  func.func @transform_5(%arg0: i32, %arg1: i32) -> (i32, i32) {
    %c0_i32 = arith.constant 0 : i32
    %c0_i32_0 = arith.constant 0 : i32
    %c0_i32_1 = arith.constant 0 : i32
    return %c0_i32, %c0_i32_0 : i32, i32
  }
  func.func @transform_6(%arg0: i32, %arg1: i32) -> (i32, i32) {
    %c0_i32 = arith.constant 0 : i32
    %c0_i32_0 = arith.constant 0 : i32
    %c0_i32_1 = arith.constant 0 : i32
    return %c0_i32, %c0_i32_0 : i32, i32
  }
  func.func @transform_7(%arg0: i32, %arg1: i32) -> (i32, i32, i32, i32) {
    %c0_i32 = arith.constant 0 : i32
    %c0_i32_0 = arith.constant 0 : i32
    %c0_i32_1 = arith.constant 0 : i32
    return %arg0, %arg1, %c0_i32, %c0_i32_0 : i32, i32, i32, i32
  }
}

</mosaic_0001>

<bundles_post_ra>
// kernel: inverted_residual_forward.1
= control target key start
LH: loop header
LB: loop body
LE: loop exit
PB: predicated region body
PF: predicated region fallthrough
CT: control target
= control target key end

     0   :  { %s2212_s24 = smov 0   ;;  %s2214_s25 = smov 0   ;;  %s3235_s0 = inlined_call_operand.vmem [shape: f32[2,18,1,24,4], index: 0, kind: input, shape index: {}]   ;;  %s3236_s1 = inlined_call_operand.vmem [shape: f32[4,128], index: 1, kind: input, shape index: {}]   ;;  %s3237_s2 = inlined_call_operand.vmem [shape: f32[1,128], index: 2, kind: input, shape index: {}]   ;;  %s3238_s3 = inlined_call_operand.vmem [shape: f32[3,3,128], index: 3, kind: input, shape index: {}]   ;;  %s3239_s4 = inlined_call_operand.vmem [shape: f32[1,128], index: 4, kind: input, shape index: {}]   ;;  %s3240_s5 = inlined_call_operand.vmem [shape: f32[128,4], index: 5, kind: input, shape index: {}]   ;;  %s3241_s6 = inlined_call_operand.vmem [shape: f32[1,4], index: 6, kind: input, shape index: {}]   ;;  %s3242_s7 = inlined_call_operand.vmem [shape: f32[2,16,16,4], index: 7, kind: output, shape index: {}]  }
   0x1   :  { %s2216_s26 = smov 0   ;;  %s2218_s27 = smov 0  }
   0x2   :  { %s2220_s28 = smov 0  }
   0x3 LB: > { %s26_s29 = sadd.s32 1, %s2162_s26  ;;  %s29_s30 = sadd.s32 1, %s2166_s27  ;;  %s2170_s28 = sphi %s2220_s28, %s17_s28   ;;  %s2166_s27 = sphi %s2218_s27, %s3306_s27   ;;  %s2162_s26 = sphi %s2216_s26, %s3305_s26   ;;  %s2158_s25 = sphi %s2214_s25, %s3304_s25   ;;  %s2154_s24 = sphi %s2212_s24, %s3303_s24  }
   0x4   : > { %p27_p0 = scmp.ge.s32.totalorder %s26_s29, 2  ;;  %p1831_p1 = scmp.ge.s32.totalorder %s2170_s28, 1 }
   0x5   : > { %p251_p2 = scmp.lt.s32.totalorder %s2170_s28, 5 }
   0x6   : > { %s3308_s29 = smov (%p27_p0, %s26_s29), 0  ;;  %s3310_s30 = smov (!%p27_p0, %s29_s30), %s2166_s27 }
   0x7   : > { %p252_p3 = pnand %p1831_p1, %p251_p2  ;;  %p31_p4 = scmp.ge.s32.totalorder %s3310_s30, 2 }
   0x8   : > { %v337_v0 = vld [vmem:[%s3236_s1] sm:$0xf] (!%p252_p3)  ;;  %vm436_vm0 = vcmask (!%p252_p3), 1043456   ;;  %p288_p5 = scmp.lt.s32.totalorder (!%p252_p3), %s2158_s25, 1  ;;  %s1838_s10 = smul.u32 (!%p252_p3), 192, %s2154_s24  ;;  %vm345_vm1 = vcmask (!%p252_p3), 31744   ;;  %v725_v55 = vlaneseq (!%p252_p3) }
   0x9   : > { %s3312_s30 = smov (%p31_p4, %s3310_s30), 0  ;;  %255 = sbr.rel (%p252_p3) target bundleno = 584 (0x248), region = 48 }
   0xa   : > { %1956 = vmatprep.subr.msk.mxu0 (!%p252_p3), %vm436_vm0, %v337_v0  ;;  %v1512_v31 = vld [vmem:[%s3240_s5] sm:$0xff] (!%p252_p3)  ;;  %v1513_v32 = vld [vmem:[%s3240_s5 + $0x8] sm:$0xff] (!%p252_p3)  ;;  %v1514_v34 = vld [vmem:[%s3240_s5 + $0x10] sm:$0xff] (!%p252_p3)  ;;  %s2365_s18 = sshll.u32 (!%p252_p3), %s2154_s24, 3  ;;  %v2370_v57 = vshrl.u32 (!%p252_p3), %v725_v55, 7 }
   0xb   : > { %1957 = vmatpush3.msk.msra.mxu0 (!%p252_p3), %vm436_vm0, %v337_v0  ;;  %v2059_v33 = vpack.c.bf16 (!%p252_p3), %v1513_v32, %v1512_v31  ;;  %v1515_v35 = vld [vmem:[%s3240_s5 + $0x18] sm:$0xff] (!%p252_p3)  ;;  %v1516_v37 = vld [vmem:[%s3240_s5 + $0x20] sm:$0xff] (!%p252_p3)  ;;  %v1517_v38 = vld [vmem:[%s3240_s5 + $0x28] sm:$0xff] (!%p252_p3)  ;;  %v2368_v56 = vstv (!%p252_p3), %s2365_s18  ;;  %p296_p6 = scmp.lt.s32.totalorder (!%p252_p3), %s2365_s18, 15 }
   0xc   : > { %v2063_v36 = vpack.c.bf16 (!%p252_p3), %v1515_v35, %v1514_v34  ;;  %v2067_v39 = vpack.c.bf16 (!%p252_p3), %v1517_v38, %v1516_v37  ;;  %v1518_v40 = vld [vmem:[%s3240_s5 + $0x30] sm:$0xff] (!%p252_p3)  ;;  %v1519_v41 = vld [vmem:[%s3240_s5 + $0x38] sm:$0xff] (!%p252_p3)  ;;  %v1520_v43 = vld [vmem:[%s3240_s5 + $0x40] sm:$0xff] (!%p252_p3)  ;;  %vm729_vm2 = vcmp.ge.s32.totalorder (!%p252_p3), %v2368_v56, 1  ;;  %vm739_vm3 = vcmp.lt.s32.totalorder (!%p252_p3), %v2368_v56, 17 }
   0xd   : > { %2060 = vmatprep.subr.bf16.mxu1 (!%p252_p3), %v2059_v33  ;;  %v2071_v42 = vpack.c.bf16 (!%p252_p3), %v1519_v41, %v1518_v40  ;;  %v1521_v44 = vld [vmem:[%s3240_s5 + $0x48] sm:$0xff] (!%p252_p3)  ;;  %v1522_v46 = vld [vmem:[%s3240_s5 + $0x50] sm:$0xff] (!%p252_p3)  ;;  %v1523_v47 = vld [vmem:[%s3240_s5 + $0x58] sm:$0xff] (!%p252_p3)  ;;  %v716_v59 = vadd.s32 (!%p252_p3), 1, %v2368_v56  ;;  %vm759_vm5 = vcmp.ge.s32.totalorder (!%p252_p3), %v2370_v57, 1  ;;  %v953_v0 = vsub.s32 (!%p252_p3), 0, %v2370_v57 }
   0xe   : > { %2062 = vmatpush3.bf16.msra.mxu1 (!%p252_p3), %v2059_v33  ;;  %v2075_v45 = vpack.c.bf16 (!%p252_p3), %v1521_v44, %v1520_v43  ;;  %v2079_v48 = vpack.c.bf16 (!%p252_p3), %v1523_v47, %v1522_v46  ;;  %v1524_v49 = vld [vmem:[%s3240_s5 + $0x60] sm:$0xff] (!%p252_p3)  ;;  %v1525_v50 = vld [vmem:[%s3240_s5 + $0x68] sm:$0xff] (!%p252_p3)  ;;  %v1526_v52 = vld [vmem:[%s3240_s5 + $0x70] sm:$0xff] (!%p252_p3)  ;;  %v2454_v38 = vadd.s32 (!%p252_p3), 4, %v2368_v56  ;;  %v2488_v55 = vadd.s32 (!%p252_p3), 6, %v2368_v56 }
   0xf   : > { %2064 = vmatprep.subr.bf16.mxu1 (!%p252_p3), %v2063_v36  ;;  %v2083_v51 = vpack.c.bf16 (!%p252_p3), %v1525_v50, %v1524_v49  ;;  %v1527_v53 = vld [vmem:[%s3240_s5 + $0x78] sm:$0xff] (!%p252_p3)  ;;  %v2375_v58 = vld [vmem:[%s3237_s2] ss:$0 sm:$0xff] (!%p252_p3)  ;;  %vm2381_vm4 = vmand (!%p252_p3), %vm729_vm2, %vm739_vm3  ;;  %vm730_vm6 = vcmp.ge.s32.totalorder (!%p252_p3), %v716_v59, 1  ;;  %vm740_vm7 = vcmp.lt.s32.totalorder (!%p252_p3), %v716_v59, 17  ;;  %v2491_v59 = vadd.s32 (!%p252_p3), 7, %v2368_v56 }
  0x10   : > { %s3314_s25 = smov (!%p288_p5, %s2158_s25), 1  ;;  %v2087_v54 = vpack.c.bf16 %v1527_v53, %v1526_v52  ;;  %vm2402_vm8 = vmand %vm2381_vm4, %vm759_vm5  ;;  %v2482_v52 = vadd.s32 5, %v2368_v56  ;;  %v2496_v62 = vadd.s32 8, %v2368_v56  ;;  %s3316_s18 = smov (!%p296_p6, %s2365_s18), 15 }
  0x11   : > { %s2091_s11 = smul.u32 432, %s3314_s25  ;;  %vm2413_vm9 = vmand %vm730_vm6, %vm740_vm7  ;;  %vm743_vm6 = vcmp.lt.s32.totalorder %v2454_v38, 17  ;;  %s1834_s12 = sshll.u32 %s3316_s18, 1 }
  0x12   : > { %2066 = vmatpush3.bf16.msra.mxu1 %v2063_v36  ;;  %vm2436_vm11 = vmand %vm2413_vm9, %vm759_vm5  ;;  %s1835_s13 = sshll.u32 %s3314_s25, 5 }
  0x13   : > { %s292_s14 = scalar_lea.vmem %s3235_s0, %s2091_s11  ;;  %2068 = vmatprep.subr.bf16.mxu1 %v2067_v39 }
  0x14   : > { %s2254_s15 = scalar_lea.vmem %s292_s14, %s1838_s10  ;;  %s300_s14 = sadd.s32 %s1835_s13, %s1834_s12 }
  0x15   : > { %v307_v1 = vld [vmem:[%s2254_s15] sm:$0xff]  ;;  %v308_v2 = vld [vmem:[%s2254_s15 + $0x8] sm:$0xff]  ;;  %v309_v3 = vld [vmem:[%s2254_s15 + $0x10] sm:$0xff]  ;;  %s1836_s19 = sshll.u32 %s300_s14, 3 }
  0x16   : > { %1958 = vmatprep.mubr.msk.f32.mxu0 %vm345_vm1, %v307_v1  ;;  %v310_v4 = vld [vmem:[%s2254_s15 + $0x18] sm:$0xff]  ;;  %v311_v5 = vld [vmem:[%s2254_s15 + $0x20] sm:$0xff]  ;;  %v312_v6 = vld [vmem:[%s2254_s15 + $0x28] sm:$0xff]  ;;  %2070 = vmatpush3.bf16.msra.mxu1 %v2067_v39  ;;  %s3157_s18 = scalar_lea.vmem %s3242_s7, %s1836_s19 }
  0x17   : > { %1959 = vmatmul.mubr.msk.f32.vlgmr.msra.gmra.mrb[0].mxu0 %vm345_vm1, %v308_v2  ;;  %v313_v7 = vld [vmem:[%s2254_s15 + $0x30] sm:$0xff]  ;;  %v314_v8 = vld [vmem:[%s2254_s15 + $0x38] sm:$0xff]  ;;  %v315_v9 = vld [vmem:[%s2254_s15 + $0x40] sm:$0xff]  ;;  %2072 = vmatprep.subr.bf16.mxu1 %v2071_v42 }
  0x18   : > { %1961 = vmatprep.mubr.msk.f32.mxu0 %vm345_vm1, %v309_v3  ;;  %v316_v10 = vld [vmem:[%s2254_s15 + $0x48] sm:$0xff]  ;;  %v317_v11 = vld [vmem:[%s2254_s15 + $0x50] sm:$0xff]  ;;  %v318_v12 = vld [vmem:[%s2254_s15 + $0x58] sm:$0xff]  ;;  %v2392_v3 = vadd.s32 16, %v2370_v57 }
  0x19   : > { %v319_v13 = vld [vmem:[%s2254_s15 + $0x60] sm:$0xff]  ;;  %v320_v14 = vld [vmem:[%s2254_s15 + $0x68] sm:$0xff]  ;;  %v321_v15 = vld [vmem:[%s2254_s15 + $0x70] sm:$0xff] }
  0x1a   : > { %v322_v16 = vld [vmem:[%s2254_s15 + $0x78] sm:$0xff]  ;;  %v323_v17 = vld [vmem:[%s2254_s15 + $0x80] sm:$0xff]  ;;  %v324_v18 = vld [vmem:[%s2254_s15 + $0x88] sm:$0xff]  ;;  %2074 = vmatpush3.bf16.msra.mxu1 %v2071_v42  ;;  %vm794_vm10 = vcmp.lt.s32.totalorder %v2392_v3, 17 }
  0x1b   : > { %1962 = vmatmul.mubr.msk.f32.gmra.mrb[2].mxu0 %vm345_vm1, %v310_v4  ;;  %v325_v19 = vld [vmem:[%s2254_s15 + $0x90] sm:$0xff]  ;;  %v326_v20 = vld [vmem:[%s2254_s15 + $0x98] sm:$0xff]  ;;  %v327_v21 = vld [vmem:[%s2254_s15 + $0xa0] sm:$0xff]  ;;  %2076 = vmatprep.subr.bf16.mxu1 %v2075_v45 }
  0x1c   : > { %1964 = vmatprep.mubr.msk.f32.mxu0 %vm345_vm1, %v311_v5  ;;  %v328_v22 = vld [vmem:[%s2254_s15 + $0xa8] sm:$0xff]  ;;  %v329_v23 = vld [vmem:[%s2254_s15 + $0xb0] sm:$0xff]  ;;  %v330_v24 = vld [vmem:[%s2254_s15 + $0xb8] sm:$0xff] }
  0x1d   : > { %v331_v25 = vld [vmem:[%s2254_s15 + $0xc0] sm:$0xff]  ;;  %v332_v26 = vld [vmem:[%s2254_s15 + $0xc8] sm:$0xff]  ;;  %v333_v27 = vld [vmem:[%s2254_s15 + $0xd0] sm:$0xff] }
  0x1e   : > { %v334_v28 = vld [vmem:[%s2254_s15 + $0xd8] sm:$0xff]  ;;  %v335_v29 = vld [vmem:[%s2254_s15 + $0xe0] sm:$0xff]  ;;  %v336_v30 = vld [vmem:[%s2254_s15 + $0xe8] sm:$0xff]  ;;  %2078 = vmatpush3.bf16.msra.mxu1 %v2075_v45 }
  0x1f   : > { %1965 = vmatmul.mubr.msk.f32.gmra.mrb[4].mxu0 %vm345_vm1, %v312_v6  ;;  %2080 = vmatprep.subr.bf16.mxu1 %v2079_v48  ;;  %v945_v2 = vld [vmem:[%s3238_s3] sm:$0x7]  ;;  %v946_v5 = vld [vmem:[%s3238_s3 + $0x4] sm:$0x7]  ;;  %v963_v6 = vsub.s32 1, %v2370_v57  ;;  %vm2447_vm12 = vmand %vm2381_vm4, %vm794_vm10 }
  0x20   : > { %1967 = vmatprep.mubr.msk.f32.mxu0 %vm345_vm1, %v313_v7  ;;  %vm2470_vm15 = vmand %vm2413_vm9, %vm794_vm10 }
  0x21   : > { %v2441_v31 = vrot.slane %v946_v5, %v963_v6 }
  0x22   : > { %2082 = vmatpush3.bf16.msra.mxu1 %v2079_v48 }
  0x23   : > { %1968 = vmatmul.mubr.msk.f32.gmra.mrb[6].mxu0 %vm345_vm1, %v314_v8  ;;  %2084 = vmatprep.subr.bf16.mxu1 %v2083_v51 }
  0x24   : > { %1970 = vmatprep.mubr.msk.f32.mxu0 %vm345_vm1, %v315_v9  ;;  %v947_v9 = vld [vmem:[%s3238_s3 + $0x8] sm:$0x7] }
  0x25   : > { %v2458_v40 = vrot.slane %v947_v9, %v963_v6 }
  0x26   : > { %2086 = vmatpush3.bf16.msra.mxu1 %v2083_v51 }
  0x27   : > { %1971 = vmatmul.mubr.msk.f32.gmra.mrb[8].mxu0 %vm345_vm1, %v316_v10  ;;  %2088 = vmatprep.subr.bf16.mxu1 %v2087_v54  ;;  %v973_v10 = vsub.s32 2, %v2370_v57 }
  0x28   : > { %1973 = vmatprep.mubr.msk.f32.mxu0 %vm345_vm1, %v317_v11 }
  0x29   : > { %v2456_v39 = vrot.slane %v946_v5, %v973_v10  ;;  %v2462_v43 = vrot.slane %v947_v9, %v973_v10 }
  0x2a   : > { %2090 = vmatpush3.bf16.msra.mxu1 %v2087_v54 }
  0x2b   : > { %1974 = vmatmul.mubr.msk.f32.gmra.mrb[10].mxu0 %vm345_vm1, %v318_v12 }
  0x2c   : > { %1976 = vmatprep.mubr.msk.f32.mxu0 %vm345_vm1, %v319_v13  ;;  %v2410_v13 = vrot.slane %v945_v2, %v953_v0 }
  0x2f   : > { %1977 = vmatmul.mubr.msk.f32.gmra.mrb[12].mxu0 %vm345_vm1, %v320_v14 }
  0x30   : > { %1979 = vmatprep.mubr.msk.f32.mxu0 %vm345_vm1, %v321_v15 }
  0x33   : > { %1980 = vmatmul.mubr.msk.f32.gmra.mrb[14].mxu0 %vm345_vm1, %v322_v16 }
  0x34   : > { %1982 = vmatprep.mubr.msk.f32.mxu0 %vm345_vm1, %v323_v17  ;;  %v717_v17 = vadd.s32 2, %v2368_v56 }
  0x36   : > { %vm731_vm13 = vcmp.ge.s32.totalorder %v717_v17, 1  ;;  %vm741_vm14 = vcmp.lt.s32.totalorder %v717_v17, 17 }
  0x37   : > { %1983 = vmatmul.mubr.msk.f32.gmra.mrb[16].mxu0 %vm345_vm1, %v324_v18  ;;  %vm2477_vm2 = vmand %vm731_vm13, %vm741_vm14 }
  0x38   : > { %1985 = vmatprep.mubr.msk.f32.mxu0 %vm345_vm1, %v325_v19  ;;  %v2418_v19 = vrot.slane %v946_v5, %v953_v0  ;;  %vm2507_vm7 = vmand %vm2477_vm2, %vm759_vm5 }
  0x39   : > { %vm2559_vm13 = vmand %vm2477_vm2, %vm794_vm10 }
  0x3b   : > { %1986 = vmatmul.mubr.msk.f32.gmra.mrb[18].mxu0 %vm345_vm1, %v326_v20 }
  0x3c   : > { %1988 = vmatprep.mubr.msk.f32.mxu0 %vm345_vm1, %v327_v21 }
  0x3f   : > { %1989 = vmatmul.mubr.msk.f32.gmra.mrb[20].mxu0 %vm345_vm1, %v328_v22  ;;  %v2424_v22 = vrot.slane %v945_v2, %v963_v6 }
  0x40   : > { %1991 = vmatprep.mubr.msk.f32.mxu0 %vm345_vm1, %v329_v23  ;;  %v2426_v23 = vrot.slane %v947_v9, %v953_v0 }
  0x43   : > { %1992 = vmatmul.mubr.msk.f32.gmra.mrb[22].mxu0 %vm345_vm1, %v330_v24 }
  0x44   : > { %1994 = vmatprep.mubr.msk.f32.mxu0 %vm345_vm1, %v331_v25 }
  0x47   : > { %1995 = vmatmul.mubr.msk.f32.gmra.mrb[24].mxu0 %vm345_vm1, %v332_v26  ;;  %v2430_v26 = vrot.slane %v945_v2, %v973_v10 }
  0x48   : > { %1997 = vmatprep.mubr.msk.f32.mxu0 %vm345_vm1, %v333_v27 }
  0x4b   : > { %1998 = vmatmul.mubr.msk.f32.gmra.mrb[26].mxu0 %vm345_vm1, %v334_v28 }
  0x4c   : > { %2000 = vmatprep.mubr.msk.f32.mxu0 %vm345_vm1, %v335_v29 }
  0x4f   : > { %2001 = vmatmul.mubr.msk.f32.gmra.mrb[28].mxu0 %vm345_vm1, %v336_v30  ;;  %v718_v30 = vadd.s32 3, %v2368_v56 }
  0x51   : > { %vm732_vm0 = vcmp.ge.s32.totalorder %v718_v30, 1  ;;  %vm742_vm3 = vcmp.lt.s32.totalorder %v718_v30, 17 }
  0xea   : > { %v1960_v60 = vpop.f32.mrb[0].mxu0 }
  0xeb   : > { %v512_v61 = vadd.f32 %v1960_v60, %v2375_v58  ;;  %v506_v63 = vpop.f32.mrb[1].mxu0 }
  0xec   : > { %v507_v1 = vadd.f32 %v2375_v58, %v506_v63  ;;  %v2499_v63 = vadd.s32 9, %v2368_v56 }
  0xed   : > { %v656_v4 = vmax.f32 %v512_v61, 0.0 }
  0xee   : > { %v655_v7 = vmax.f32 %v507_v1, 0.0  ;;  %v1963_v11 = vpop.f32.mrb[2].mxu0 }
  0xef   : > { %v686_v12 = vmin.f32 %v656_v4, 6.0  ;;  %v522_v14 = vadd.f32 %v1963_v11, %v2375_v58  ;;  %v516_v16 = vpop.f32.mrb[3].mxu0 }
  0xf0   : > { %v685_v18 = vmin.f32 %v655_v7, 6.0  ;;  %v517_v20 = vadd.f32 %v2375_v58, %v516_v16 }
  0xf1   : > { %v886_v21 = vsel %vm2381_vm4, %v686_v12, 0.0  ;;  %v658_v24 = vmax.f32 %v522_v14, 0.0  ;;  %vm733_vm4 = vcmp.ge.s32.totalorder %v2454_v38, 1 }
  0xf2   : > { %916 = vst [vmem:[#allocation2 + $0x8] sm:$0xff] %v886_v21  ;;  %v885_v25 = vsel %vm2402_vm8, %v685_v18, 0.0  ;;  %v657_v28 = vmax.f32 %v517_v20, 0.0  ;;  %v1966_v29 = vpop.f32.mrb[4].mxu0  ;;  %v956_v56 = vmul.f32 %v2410_v13, %v886_v21  ;;  %vm2516_vm8 = vmand %vm732_vm0, %vm742_vm3  ;;  %vm735_vm0 = vcmp.ge.s32.totalorder %v2488_v55, 1 }
  0xf3   : > { %915 = vst [vmem:[#allocation2] sm:$0xff] %v885_v25  ;;  %v688_v32 = vmin.f32 %v658_v24, 6.0  ;;  %v532_v34 = vadd.f32 %v1966_v29, %v2375_v58  ;;  %v526_v35 = vpop.f32.mrb[5].mxu0  ;;  %v955_v5 = vmul.f32 %v2410_v13, %v885_v25  ;;  %vm2577_vm14 = vmand %vm2516_vm8, %vm794_vm10 }
  0xf4   : > { %v687_v36 = vmin.f32 %v657_v28, 6.0  ;;  %v527_v37 = vadd.f32 %v2375_v58, %v526_v35 }
  0xf5   : > { %v888_v41 = vsel %vm2436_vm11, %v688_v32, 0.0  ;;  %v660_v42 = vmax.f32 %v532_v34, 0.0  ;;  %vm744_vm11 = vcmp.lt.s32.totalorder %v2482_v52, 17 }
  0xf6   : > { %918 = vst [vmem:[#allocation2 + $0x18] sm:$0xff] %v888_v41  ;;  %v887_v44 = vsel %vm2447_vm12, %v687_v36, 0.0  ;;  %v659_v46 = vmax.f32 %v527_v37, 0.0  ;;  %v1969_v47 = vpop.f32.mrb[6].mxu0  ;;  %v986_v14 = vmul.f32 %v2418_v19, %v888_v41  ;;  %v2527_v18 = vmul.f32 %v2410_v13, %v888_v41  ;;  %vm2543_vm12 = vmand %vm2516_vm8, %vm759_vm5 }
  0xf7   : > { %917 = vst [vmem:[#allocation2 + $0x10] sm:$0xff] %v887_v44  ;;  %v690_v48 = vmin.f32 %v660_v42, 6.0  ;;  %v542_v49 = vadd.f32 %v1969_v47, %v2375_v58  ;;  %v536_v51 = vpop.f32.mrb[7].mxu0 }
  0xf8   : > { %v689_v53 = vmin.f32 %v659_v46, 6.0  ;;  %v537_v54 = vadd.f32 %v2375_v58, %v536_v51 }
  0xf9   : > { %v890_v60 = vsel %vm2470_vm15, %v690_v48, 0.0  ;;  %v662_v61 = vmax.f32 %v542_v49, 0.0  ;;  %vm2599_vm15 = vmand %vm733_vm4, %vm743_vm6  ;;  %vm736_vm6 = vcmp.ge.s32.totalorder %v2491_v59, 1 }
  0xfa   : > { %920 = vst [vmem:[#allocation2 + $0x28] sm:$0xff] %v890_v60  ;;  %v889_v0 = vsel %vm2413_vm9, %v689_v53, 0.0  ;;  %v661_v1 = vmax.f32 %v537_v54, 0.0  ;;  %v1972_v4 = vpop.f32.mrb[8].mxu0  ;;  %v959_v6 = vld [vmem:[#allocation2 + $0x1] sm:$0xff]  ;;  %vm734_vm9 = vcmp.ge.s32.totalorder %v2482_v52, 1  ;;  %vm2624_vm3 = vmand %vm2599_vm15, %vm759_vm5 }
  0xfb   : > { %v969_v7 = vld [vmem:[#allocation2 + $0x2] sm:$0xff]  ;;  %919 = vst [vmem:[#allocation2 + $0x20] sm:$0xff] %v889_v0  ;;  %v692_v8 = vmin.f32 %v662_v61, 6.0  ;;  %v552_v9 = vadd.f32 %v1972_v4, %v2375_v58  ;;  %v546_v11 = vpop.f32.mrb[9].mxu0  ;;  %v965_v12 = vmul.f32 %v2424_v22, %v959_v6  ;;  %v987_v25 = vmul.f32 %v2418_v19, %v889_v0  ;;  %vm2639_vm4 = vmand %vm734_vm9, %vm744_vm11 }
  0xfc   : > { %v691_v15 = vmin.f32 %v661_v1, 6.0  ;;  %v547_v16 = vadd.f32 %v2375_v58, %v546_v11  ;;  %v975_v17 = vmul.f32 %v2430_v26, %v969_v7  ;;  %v2552_v35 = vmul.f32 %v2410_v13, %v889_v0  ;;  %vm2678_vm9 = vmand %vm2599_vm15, %vm794_vm10 }
  0xfd   : > { %v2531_v20 = vsel %vm2477_vm2, %v692_v8, 0.0  ;;  %v664_v21 = vmax.f32 %v552_v9, 0.0  ;;  %v967_v24 = vadd.f32 %v965_v12, %v955_v5  ;;  %vm745_vm2 = vcmp.lt.s32.totalorder %v2488_v55, 17  ;;  %vm2705_vm11 = vmand %vm2639_vm4, %vm794_vm10 }
  0xfe   : > { %922 = vst [vmem:[#allocation2 + $0x38] sm:$0xff] %v2531_v20  ;;  %v2537_v27 = vsel %vm2507_vm7, %v691_v15, 0.0  ;;  %v663_v29 = vmax.f32 %v547_v16, 0.0  ;;  %v1975_v30 = vpop.f32.mrb[10].mxu0  ;;  %v960_v32 = vld [vmem:[#allocation2 + $0x9] sm:$0xff]  ;;  %v2549_v34 = vmul.f32 %v2426_v23, %v2531_v20  ;;  %vm746_vm7 = vcmp.lt.s32.totalorder %v2491_v59, 17 }
  0xff   : > { %v970_v33 = vld [vmem:[#allocation2 + $0xa] sm:$0xff]  ;;  %921 = vst [vmem:[#allocation2 + $0x30] sm:$0xff] %v2537_v27  ;;  %v694_v36 = vmin.f32 %v664_v21, 6.0  ;;  %v562_v41 = vadd.f32 %v1975_v30, %v2375_v58  ;;  %v556_v42 = vpop.f32.mrb[11].mxu0  ;;  %v977_v44 = vadd.f32 %v975_v17, %v967_v24  ;;  %v1017_v45 = vmul.f32 %v2426_v23, %v2537_v27 }
 0x100   : > { %v693_v46 = vmin.f32 %v663_v29, 6.0  ;;  %v557_v47 = vadd.f32 %v2375_v58, %v556_v42  ;;  %v966_v48 = vmul.f32 %v2424_v22, %v960_v32  ;;  %v976_v49 = vmul.f32 %v2430_v26, %v970_v33 }
 0x101   : > { %v2571_v50 = vsel %vm2543_vm12, %v694_v36, 0.0  ;;  %v666_v51 = vmax.f32 %v562_v41, 0.0  ;;  %v988_v54 = vadd.f32 %v986_v14, %v977_v44  ;;  %v2583_v60 = vmul.f32 %v2418_v19, %v2537_v27  ;;  %vm2716_vm12 = vmand %vm735_vm0, %vm745_vm2 }
 0x102   : > { %924 = vst [vmem:[#allocation2 + $0x48] sm:$0xff] %v2571_v50  ;;  %v893_v61 = vsel %vm2559_vm13, %v693_v46, 0.0  ;;  %v665_v0 = vmax.f32 %v557_v47, 0.0  ;;  %v1978_v1 = vpop.f32.mrb[12].mxu0  ;;  %v990_v2 = vld [vmem:[#allocation2 + $0x19] sm:$0xff]  ;;  %v968_v5 = vadd.f32 %v966_v48, %v956_v56  ;;  %v2588_v6 = vld [vmem:[#allocation2 + $0x21] sm:$0xff]  ;;  %v2592_v7 = vmul.f32 %v2426_v23, %v2571_v50  ;;  %vm2754_vm0 = vmand %vm736_vm6, %vm746_vm7 }
 0x103   : > { %v1000_v4 = vld [vmem:[#allocation2 + $0x1a] sm:$0xff]  ;;  %923 = vst [vmem:[#allocation2 + $0x40] sm:$0xff] %v893_v61  ;;  %v696_v8 = vmin.f32 %v666_v51, 6.0  ;;  %v572_v9 = vadd.f32 %v1978_v1, %v2375_v58  ;;  %v566_v12 = vpop.f32.mrb[13].mxu0  ;;  %v996_v56 = vmul.f32 %v2441_v31, %v990_v2  ;;  %v2605_v15 = vld [vmem:[#allocation2 + $0x22] sm:$0xff]  ;;  %v997_v38 = vmul.f32 %v2441_v31, %v2588_v6  ;;  %vm2813_vm6 = vmand %vm2754_vm0, %vm794_vm10 }
 0x104   : > { %v1006_v14 = vmul.f32 %v2456_v39, %v1000_v4  ;;  %v695_v16 = vmin.f32 %v665_v0, 6.0  ;;  %v567_v17 = vadd.f32 %v2375_v58, %v566_v12  ;;  %v978_v21 = vadd.f32 %v976_v49, %v968_v5 }
 0x105   : > { %v896_v24 = vsel %vm2577_vm14, %v696_v8, 0.0  ;;  %v668_v28 = vmax.f32 %v572_v9, 0.0  ;;  %v998_v29 = vadd.f32 %v996_v56, %v988_v54  ;;  %v1007_v30 = vmul.f32 %v2456_v39, %v2605_v15 }
 0x106   : > { %926 = vst [vmem:[#allocation2 + $0x58] sm:$0xff] %v896_v24  ;;  %v2618_v32 = vsel %vm2516_vm8, %v695_v16, 0.0  ;;  %v667_v33 = vmax.f32 %v567_v17, 0.0  ;;  %v1981_v37 = vpop.f32.mrb[14].mxu0  ;;  %v2628_v41 = vld [vmem:[#allocation2 + $0x31] sm:$0xff]  ;;  %v989_v44 = vadd.f32 %v987_v25, %v978_v21  ;;  %v1063_v46 = vmul.f32 %v990_v2, %v2424_v22  ;;  %vm2664_vm8 = vmand %vm2639_vm4, %vm759_vm5 }
 0x107   : > { %v2630_v42 = vld [vmem:[#allocation2 + $0x32] sm:$0xff]  ;;  %925 = vst [vmem:[#allocation2 + $0x50] sm:$0xff] %v2618_v32  ;;  %v698_v10 = vmin.f32 %v668_v28, 6.0  ;;  %v582_v47 = vadd.f32 %v1981_v37, %v2375_v58  ;;  %v576_v49 = vpop.f32.mrb[15].mxu0  ;;  %v1008_v51 = vadd.f32 %v1006_v14, %v998_v29  ;;  %v1027_v25 = vmul.f32 %v2458_v40, %v2628_v41 }
 0x108   : > { %v697_v53 = vmin.f32 %v667_v33, 6.0  ;;  %v577_v54 = vadd.f32 %v2375_v58, %v576_v49  ;;  %v1037_v61 = vmul.f32 %v2462_v43, %v2630_v42  ;;  %v999_v52 = vadd.f32 %v997_v38, %v989_v44  ;;  %v2689_v33 = vld [vmem:[%s3239_s4] ss:$0 sm:$0xff] }
 0x109   : > { %v2652_v0 = vsel %vm2599_vm15, %v698_v10, 0.0  ;;  %v670_v1 = vmax.f32 %v582_v47, 0.0  ;;  %v1019_v2 = vadd.f32 %v1017_v45, %v1008_v51  ;;  %v1065_v5 = vadd.f32 %v1063_v46, %v2527_v18  ;;  %vm2741_vm15 = vmand %vm2716_vm12, %vm759_vm5 }
 0x10a   : > { %928 = vst [vmem:[#allocation2 + $0x68] sm:$0xff] %v2652_v0  ;;  %v2658_v8 = vsel %vm2624_vm3, %v697_v53, 0.0  ;;  %v669_v12 = vmax.f32 %v577_v54, 0.0  ;;  %v1984_v56 = vpop.f32.mrb[16].mxu0  ;;  %v1009_v14 = vadd.f32 %v1007_v30, %v999_v52  ;;  %v2668_v45 = vld [vmem:[#allocation2 + $0x39] sm:$0xff]  ;;  %v1069_v16 = vmul.f32 %v1000_v4, %v2430_v26  ;;  %vm2778_vm3 = vmand %vm2754_vm0, %vm759_vm5 }
 0x10b   : > { %v2670_v18 = vld [vmem:[#allocation2 + $0x3a] sm:$0xff]  ;;  %927 = vst [vmem:[#allocation2 + $0x60] sm:$0xff] %v2658_v8  ;;  %v700_v17 = vmin.f32 %v670_v1, 6.0  ;;  %v592_v38 = vadd.f32 %v1984_v56, %v2375_v58  ;;  %v586_v24 = vpop.f32.mrb[17].mxu0  ;;  %v1029_v28 = vadd.f32 %v1027_v25, %v1019_v2  ;;  %v1028_v29 = vmul.f32 %v2458_v40, %v2668_v45 }
 0x10c   : > { %v699_v30 = vmin.f32 %v669_v12, 6.0  ;;  %v587_v4 = vadd.f32 %v2375_v58, %v586_v24  ;;  %v1020_v11 = vadd.f32 %v2549_v34, %v1009_v14  ;;  %v1038_v36 = vmul.f32 %v2462_v43, %v2670_v18 }
 0x10d   : > { %v2696_v37 = vsel %vm2664_vm8, %v700_v17, 0.0  ;;  %v672_v44 = vmax.f32 %v592_v38, 0.0  ;;  %v1039_v46 = vadd.f32 %v1037_v61, %v1029_v28  ;;  %v1071_v10 = vadd.f32 %v1069_v16, %v1065_v5 }
 0x10e   : > { %930 = vst [vmem:[#allocation2 + $0x78] sm:$0xff] %v2696_v37  ;;  %v899_v47 = vsel %vm2678_vm9, %v699_v30, 0.0  ;;  %v671_v49 = vmax.f32 %v587_v4, 0.0  ;;  %v1987_v51 = vpop.f32.mrb[18].mxu0  ;;  %v1030_v25 = vadd.f32 %v1028_v29, %v1020_v11  ;;  %v1081_v53 = vmul.f32 %v2628_v41, %v2441_v31  ;;  %v2722_v9 = vld [vmem:[#allocation2 + $0x49] sm:$0xff] }
 0x10f   : > { %929 = vst [vmem:[#allocation2 + $0x70] sm:$0xff] %v899_v47  ;;  %v702_v54 = vmin.f32 %v672_v44, 6.0  ;;  %v602_v61 = vadd.f32 %v1987_v51, %v2375_v58  ;;  %v596_v1 = vpop.f32.mrb[19].mxu0  ;;  %v1047_v2 = vadd.f32 %v2689_v33, %v1039_v46  ;;  %v1077_v5 = vadd.f32 %v2583_v60, %v1071_v10  ;;  %v2731_v60 = vld [vmem:[#allocation2 + $0x4a] sm:$0xff] }
 0x110   : > { %v701_v12 = vmin.f32 %v671_v49, 6.0  ;;  %v597_v56 = vadd.f32 %v2375_v58, %v596_v1  ;;  %v1040_v14 = vadd.f32 %v1038_v36, %v1030_v25  ;;  %vm737_vm13 = vcmp.ge.s32.totalorder %v2496_v62, 1 }
 0x111   : > { %vm747_vm14 = vcmp.lt.s32.totalorder %v2496_v62, 17  ;;  %v1087_v55 = vmul.f32 %v2630_v42, %v2456_v39  ;;  %v902_v16 = vsel %vm2705_vm11, %v702_v54, 0.0  ;;  %v674_v17 = vmax.f32 %v602_v61, 0.0 }
 0x112   : > { %v1049_v21 = vmax.f32 %v1047_v2, 0.0  ;;  %v1083_v38 = vadd.f32 %v1081_v53, %v1077_v5  ;;  %932 = vst [vmem:[#allocation2 + $0x88] sm:$0xff] %v902_v16  ;;  %v2735_v24 = vsel %vm2639_vm4, %v701_v12, 0.0  ;;  %v673_v28 = vmax.f32 %v597_v56, 0.0  ;;  %v1990_v30 = vpop.f32.mrb[20].mxu0  ;;  %vm2789_vm4 = vmand %vm2716_vm12, %vm794_vm10 }
 0x113   : > { %v1048_v4 = vadd.f32 %v2689_v33, %v1040_v14  ;;  %v1100_v11 = vmul.f32 %v2722_v9, %v2458_v40  ;;  %931 = vst [vmem:[#allocation2 + $0x80] sm:$0xff] %v2735_v24  ;;  %v704_v48 = vmin.f32 %v674_v17, 6.0  ;;  %v612_v36 = vadd.f32 %v1990_v30, %v2375_v58  ;;  %v606_v46 = vpop.f32.mrb[21].mxu0  ;;  %vm2825_vm8 = vmand %vm737_vm13, %vm747_vm14 }
 0x114   : > { %v1051_v10 = vmin.f32 %v1049_v21, 6.0  ;;  %v1089_v47 = vadd.f32 %v1087_v55, %v1083_v38  ;;  %v703_v34 = vmin.f32 %v673_v28, 6.0  ;;  %v607_v49 = vadd.f32 %v2375_v58, %v606_v46  ;;  %vm2845_vm9 = vmand %vm2825_vm8, %vm759_vm5 }
 0x115   : > { %v1050_v51 = vmax.f32 %v1048_v4, 0.0  ;;  %v1106_v25 = vmul.f32 %v2731_v60, %v2462_v43  ;;  %vm738_vm2 = vcmp.ge.s32.totalorder %v2499_v63, 1  ;;  %v2764_v53 = vsel %vm2716_vm12, %v704_v48, 0.0 }
 0x116   : > { %v676_v59 = vmax.f32 %v612_v36, 0.0  ;;  %2035 = vmatprep.mubr.f32.mxu1 %v1051_v10  ;;  %v1096_v54 = vadd.f32 %v2592_v7, %v1089_v47  ;;  %v1064_v61 = vmul.f32 %v2588_v6, %v2424_v22  ;;  %934 = vst [vmem:[#allocation2 + $0x98] sm:$0xff] %v2764_v53  ;;  %v2772_v1 = vsel %vm2741_vm15, %v703_v34, 0.0  ;;  %v1993_v12 = vpop.f32.mrb[22].mxu0 }
 0x117   : > { %v675_v5 = vmax.f32 %v607_v49, 0.0  ;;  %v1052_v7 = vmin.f32 %v1050_v51, 6.0  ;;  %v1070_v6 = vmul.f32 %v2605_v15, %v2430_v26  ;;  %933 = vst [vmem:[#allocation2 + $0x90] sm:$0xff] %v2772_v1  ;;  %v622_v55 = vadd.f32 %v1993_v12, %v2375_v58  ;;  %v616_v16 = vpop.f32.mrb[23].mxu0 }
 0x118   : > { %v706_v56 = vmin.f32 %v676_v59, 6.0  ;;  %v1102_v17 = vadd.f32 %v1100_v11, %v1096_v54  ;;  %v1066_v21 = vadd.f32 %v1064_v61, %v2552_v35  ;;  %v617_v15 = vadd.f32 %v2375_v58, %v616_v16  ;;  %v2804_v11 = vld [vmem:[#allocation2 + $0x51] sm:$0xff] }
 0x119   : > { %v705_v38 = vmin.f32 %v675_v5, 6.0  ;;  %2036 = vmatmul.mubr.f32.vlgmr.msra.gmra.mrb[0].mxu1 %v1052_v7  ;;  %v1076_v28 = vmul.f32 %v2418_v19, %v2531_v20  ;;  %v1082_v52 = vmul.f32 %v2668_v45, %v2441_v31  ;;  %v678_v30 = vmax.f32 %v622_v55, 0.0 }
 0x11a   : > { %v2802_v29 = vsel %vm2778_vm3, %v706_v56, 0.0  ;;  %v1108_v4 = vadd.f32 %v1106_v25, %v1102_v17  ;;  %v1072_v48 = vadd.f32 %v1070_v6, %v1066_v21  ;;  %v677_v46 = vmax.f32 %v617_v15, 0.0  ;;  %v1996_v10 = vpop.f32.mrb[24].mxu0 }
 0x11b   : > { %936 = vst [vmem:[#allocation2 + $0xa8] sm:$0xff] %v2802_v29  ;;  %v905_v35 = vsel %vm2789_vm4, %v705_v38, 0.0  ;;  %v1088_v47 = vmul.f32 %v2670_v18, %v2456_v39  ;;  %vm748_vm7 = vcmp.lt.s32.totalorder %v2499_v63, 17  ;;  %v708_v34 = vmin.f32 %v678_v30, 6.0  ;;  %v626_v25 = vpop.f32.mrb[25].mxu0 }
 0x11c   : > { %935 = vst [vmem:[#allocation2 + $0xa0] sm:$0xff] %v905_v35  ;;  %v632_v49 = vadd.f32 %v1996_v10, %v2375_v58  ;;  %v1110_v59 = vadd.f32 %v2689_v33, %v1108_v4  ;;  %v1078_v54 = vadd.f32 %v1076_v28, %v1072_v48  ;;  %v707_v61 = vmin.f32 %v677_v46, 6.0  ;;  %vm2859_vm11 = vmand %vm738_vm2, %vm748_vm7  ;;  %v2863_v48 = vld [vmem:[#allocation2 + $0x52] sm:$0xff] }
 0x11d   : > { %v627_v2 = vadd.f32 %v2375_v58, %v626_v25  ;;  %v1095_v5 = vmul.f32 %v2426_v23, %v2618_v32  ;;  %v1101_v12 = vmul.f32 %v2804_v11, %v2458_v40  ;;  %v908_v62 = vsel %vm2813_vm6, %v708_v34, 0.0  ;;  %vm2883_vm12 = vmand %vm2859_vm11, %vm759_vm5 }
 0x11e   : > { %v680_v7 = vmax.f32 %v632_v49, 0.0  ;;  %v1112_v6 = vmax.f32 %v1110_v59, 0.0  ;;  %v1084_v56 = vadd.f32 %v1082_v52, %v1078_v54  ;;  %938 = vst [vmem:[#allocation2 + $0xb8] sm:$0xff] %v908_v62  ;;  %v2839_v14 = vsel %vm2754_vm0, %v707_v61, 0.0  ;;  %v1999_v17 = vpop.f32.mrb[26].mxu0  ;;  %vm2896_vm5 = vmand %vm2825_vm8, %vm794_vm10 }
 0x11f   : > { %v679_v55 = vmax.f32 %v627_v2, 0.0  ;;  %v1120_v21 = vmul.f32 %v2410_v13, %v2537_v27  ;;  %v1126_v38 = vmul.f32 %v2628_v41, %v2424_v22  ;;  %937 = vst [vmem:[#allocation2 + $0xb0] sm:$0xff] %v2839_v14  ;;  %v642_v52 = vadd.f32 %v1999_v17, %v2375_v58  ;;  %v636_v4 = vpop.f32.mrb[27].mxu0  ;;  %vm2924_vm13 = vmand %vm2859_vm11, %vm794_vm10 }
 0x120   : > { %v710_v44 = vmin.f32 %v680_v7, 6.0  ;;  %v1114_v15 = vmin.f32 %v1112_v6, 6.0  ;;  %v1090_v28 = vadd.f32 %v1088_v47, %v1084_v56  ;;  %v637_v41 = vadd.f32 %v2375_v58, %v636_v4 }
 0x121   : > { %v709_v27 = vmin.f32 %v679_v55, 6.0  ;;  %v1128_v35 = vadd.f32 %v1126_v38, %v1120_v21  ;;  %v1132_v36 = vmul.f32 %v2630_v42, %v2430_v26  ;;  %v682_v10 = vmax.f32 %v642_v52, 0.0 }
 0x122   : > { %v2870_v46 = vsel %vm2825_vm8, %v710_v44, 0.0  ;;  %2038 = vmatprep.mubr.f32.mxu1 %v1114_v15  ;;  %v1097_v63 = vadd.f32 %v1095_v5, %v1090_v28  ;;  %v1138_v47 = vmul.f32 %v2418_v19, %v2571_v50  ;;  %v681_v49 = vmax.f32 %v637_v41, 0.0  ;;  %v2002_v54 = vpop.f32.mrb[28].mxu0  ;;  %v2913_v44 = vld [vmem:[#allocation2 + $0x61] sm:$0xff] }
 0x123   : > { %940 = vst [vmem:[#allocation2 + $0xc8] sm:$0xff] %v2870_v46  ;;  %v2877_v34 = vsel %vm2845_vm9, %v709_v27, 0.0  ;;  %v1134_v25 = vadd.f32 %v1132_v36, %v1128_v35  ;;  %v1144_v59 = vmul.f32 %v2722_v9, %v2441_v31  ;;  %v1107_v2 = vmul.f32 %v2863_v48, %v2462_v43  ;;  %v646_v62 = vpop.f32.mrb[29].mxu0  ;;  %v1167_v41 = vld [vmem:[#allocation2 + $0x62] sm:$0xff] }
 0x124   : > { %939 = vst [vmem:[#allocation2 + $0xc0] sm:$0xff] %v2877_v34  ;;  %v1103_v61 = vadd.f32 %v1101_v12, %v1097_v63  ;;  %v712_v5 = vmin.f32 %v682_v10, 6.0  ;;  %v711_v7 = vmin.f32 %v681_v49, 6.0  ;;  %v1150_v56 = vmul.f32 %v2731_v60, %v2456_v39 }
 0x125   : > { %v1140_v6 = vadd.f32 %v1138_v47, %v1134_v25  ;;  %v652_v12 = vadd.f32 %v2002_v54, %v2375_v58  ;;  %v647_v17 = vadd.f32 %v2375_v58, %v646_v62  ;;  %v1121_v51 = vmul.f32 %v2410_v13, %v2531_v20  ;;  %v2938_v54 = vld [vmem:[#allocation2 + $0x6a] sm:$0xff] }
 0x126   : > { %v1109_v55 = vadd.f32 %v1107_v2, %v1103_v61  ;;  %v2905_v16 = vsel %vm2883_vm12, %v712_v5, 0.0  ;;  %v911_v21 = vsel %vm2896_vm5, %v711_v7, 0.0  ;;  %v1127_v28 = vmul.f32 %v2668_v45, %v2424_v22 }
 0x127   : > { %942 = vst [vmem:[#allocation2 + $0xd8] sm:$0xff] %v2905_v16  ;;  %v1146_v38 = vadd.f32 %v1144_v59, %v1140_v6  ;;  %v684_v15 = vmax.f32 %v652_v12, 0.0  ;;  %941 = vst [vmem:[#allocation2 + $0xd0] sm:$0xff] %v911_v21  ;;  %v1157_v58 = vmul.f32 %v2426_v23, %v2658_v8  ;;  %v683_v4 = vmax.f32 %v647_v17, 0.0  ;;  %v2936_v59 = vld [vmem:[#allocation2 + $0x69] sm:$0xff] }
 0x128   : > { %v1111_v52 = vadd.f32 %v2689_v33, %v1109_v55  ;;  %v1129_v36 = vadd.f32 %v1127_v28, %v1121_v51  ;;  %v1133_v45 = vmul.f32 %v2670_v18, %v2430_v26  ;;  %v1163_v10 = vmul.f32 %v2913_v44, %v2458_v40 }
 0x129   : > { %v1152_v27 = vadd.f32 %v1150_v56, %v1146_v38  ;;  %v714_v35 = vmin.f32 %v684_v15, 6.0  ;;  %v713_v47 = vmin.f32 %v683_v4, 6.0  ;;  %v1139_v25 = vmul.f32 %v2418_v19, %v2618_v32 }
 0x12a   : > { %v1113_v63 = vmax.f32 %v1111_v52, 0.0  ;;  %v1135_v49 = vadd.f32 %v1133_v45, %v1129_v36  ;;  %v1169_v18 = vmul.f32 %v1167_v41, %v2462_v43  ;;  %v1145_v5 = vmul.f32 %v2804_v11, %v2441_v31  ;;  %v2978_v36 = vld [vmem:[#allocation2 + $0x7a] sm:$0xff] }
 0x12b   : > { %v1159_v3 = vadd.f32 %v1157_v58, %v1152_v27  ;;  %v914_v42 = vsel %vm2924_vm13, %v714_v35, 0.0  ;;  %v2943_v2 = vsel %vm2859_vm11, %v713_v47, 0.0  ;;  %v1183_v7 = vmul.f32 %v2410_v13, %v2571_v50 }
 0x12c   : > { %v1115_v61 = vmin.f32 %v1113_v63, 6.0  ;;  %944 = vst [vmem:[#allocation2 + $0xe8] sm:$0xff] %v914_v42  ;;  %943 = vst [vmem:[#allocation2 + $0xe0] sm:$0xff] %v2943_v2  ;;  %v1141_v62 = vadd.f32 %v1139_v25, %v1135_v49  ;;  %v1189_v6 = vmul.f32 %v2722_v9, %v2424_v22  ;;  %v1151_v56 = vmul.f32 %v2863_v48, %v2456_v39  ;;  %v2962_v9 = vld [vmem:[#allocation2 + $0x79] sm:$0xff]  ;;  %v2986_v49 = vld [vmem:[#allocation2 + $0x81] sm:$0xff] }
 0x12d   : > { %v1165_v57 = vadd.f32 %v1163_v10, %v1159_v3  ;;  %v1158_v30 = vmul.f32 %v2426_v23, %v2652_v0  ;;  %v1164_v12 = vmul.f32 %v2936_v59, %v2458_v40  ;;  %v1170_v55 = vmul.f32 %v2938_v54, %v2462_v43 }
 0x12e   : > { %2039 = vmatmul.mubr.f32.gmra.mrb[2].mxu1 %v1115_v61  ;;  %v1147_v51 = vadd.f32 %v1145_v5, %v1141_v62  ;;  %v1191_v21 = vadd.f32 %v1189_v6, %v1183_v7  ;;  %v1195_v50 = vmul.f32 %v2731_v60, %v2430_v26  ;;  %v1201_v38 = vmul.f32 %v2418_v19, %v2658_v8 }
 0x12f   : > { %v1171_v17 = vadd.f32 %v1169_v18, %v1165_v57  ;;  %v1207_v15 = vmul.f32 %v2913_v44, %v2441_v31  ;;  %v1184_v28 = vmul.f32 %v2410_v13, %v2618_v32  ;;  %v1190_v52 = vmul.f32 %v2804_v11, %v2424_v22 }
 0x130   : > { %v1153_v20 = vadd.f32 %v1151_v56, %v1147_v51  ;;  %v1197_v4 = vadd.f32 %v1195_v50, %v1191_v21  ;;  %v1213_v60 = vmul.f32 %v1167_v41, %v2456_v39  ;;  %v1220_v27 = vmul.f32 %v2426_v23, %v2696_v37 }
 0x131   : > { %v1173_v58 = vadd.f32 %v2689_v33, %v1171_v17  ;;  %v1226_v35 = vmul.f32 %v2962_v9, %v2458_v40  ;;  %v1192_v45 = vadd.f32 %v1190_v52, %v1184_v28  ;;  %v1196_v32 = vmul.f32 %v2863_v48, %v2430_v26 }
 0x132   : > { %v1160_v11 = vadd.f32 %v1158_v30, %v1153_v20  ;;  %v1203_v10 = vadd.f32 %v1201_v38, %v1197_v4  ;;  %v1202_v47 = vmul.f32 %v2418_v19, %v2652_v0  ;;  %v1208_v42 = vmul.f32 %v2936_v59, %v2441_v31 }
 0x133   : > { %v1175_v63 = vmax.f32 %v1173_v58, 0.0  ;;  %v1198_v3 = vadd.f32 %v1196_v32, %v1192_v45  ;;  %v1246_v25 = vmul.f32 %v2410_v13, %v2658_v8  ;;  %v1252_v61 = vmul.f32 %v2913_v44, %v2424_v22 }
 0x134   : > { %v1166_v48 = vadd.f32 %v1164_v12, %v1160_v11  ;;  %v1209_v5 = vadd.f32 %v1207_v15, %v1203_v10  ;;  %v1232_v57 = vmul.f32 %v2978_v36, %v2462_v43  ;;  %v1214_v7 = vmul.f32 %v2938_v54, %v2456_v39  ;;  %v3001_v12 = vld [vmem:[#allocation2 + $0x82] sm:$0xff]  ;;  %v3008_v15 = vld [vmem:[#allocation2 + $0x91] sm:$0xff] }
 0x135   : > { %v1177_v18 = vmin.f32 %v1175_v63, 6.0  ;;  %v1204_v62 = vadd.f32 %v1202_v47, %v1198_v3  ;;  %v1254_v6 = vadd.f32 %v1252_v61, %v1246_v25  ;;  %v1258_v56 = vmul.f32 %v1167_v41, %v2430_v26  ;;  %v3018_v63 = vld [vmem:[#allocation2 + $0x92] sm:$0xff] }
 0x136   : > { %v1172_v30 = vadd.f32 %v1170_v55, %v1166_v48  ;;  %v1215_v17 = vadd.f32 %v1213_v60, %v1209_v5  ;;  %v1221_v8 = vmul.f32 %v2426_v23, %v2735_v24  ;;  %v1227_v44 = vmul.f32 %v2986_v49, %v2458_v40 }
 0x137   : > { %2041 = vmatprep.mubr.f32.mxu1 %v1177_v18  ;;  %v1210_v51 = vadd.f32 %v1208_v42, %v1204_v62  ;;  %v1260_v21 = vadd.f32 %v1258_v56, %v1254_v6  ;;  %v1264_v50 = vmul.f32 %v2418_v19, %v2696_v37  ;;  %v1270_v38 = vmul.f32 %v2962_v9, %v2441_v31  ;;  %v3035_v6 = vld [vmem:[#allocation2 + $0x9a] sm:$0xff] }
 0x138   : > { %v1174_v41 = vadd.f32 %v2689_v33, %v1172_v30  ;;  %v1222_v55 = vadd.f32 %v1220_v27, %v1215_v17  ;;  %v1247_v28 = vmul.f32 %v2410_v13, %v2652_v0  ;;  %v1253_v52 = vmul.f32 %v2936_v59, %v2424_v22 }
 0x139   : > { %v1216_v58 = vadd.f32 %v1214_v7, %v1210_v51  ;;  %v1233_v20 = vmul.f32 %v3001_v12, %v2462_v43  ;;  %v1266_v4 = vadd.f32 %v1264_v50, %v1260_v21  ;;  %v1276_v60 = vmul.f32 %v2978_v36, %v2456_v39  ;;  %v3033_v7 = vld [vmem:[#allocation2 + $0x99] sm:$0xff] }
 0x13a   : > { %v1176_v45 = vmax.f32 %v1174_v41, 0.0  ;;  %v1228_v32 = vadd.f32 %v1226_v35, %v1222_v55  ;;  %v1255_v27 = vadd.f32 %v1253_v52, %v1247_v28  ;;  %v1259_v11 = vmul.f32 %v2938_v54, %v2430_v26 }
 0x13b   : > { %v1223_v0 = vadd.f32 %v1221_v8, %v1216_v58  ;;  %v1272_v10 = vadd.f32 %v1270_v38, %v1266_v4  ;;  %v1283_v59 = vmul.f32 %v2426_v23, %v2772_v1  ;;  %v1289_v47 = vmul.f32 %v3008_v15, %v2458_v40 }
 0x13c   : > { %v1178_v3 = vmin.f32 %v1176_v45, 6.0  ;;  %v1234_v42 = vadd.f32 %v1232_v57, %v1228_v32  ;;  %v1261_v25 = vadd.f32 %v1259_v11, %v1255_v27  ;;  %v1265_v35 = vmul.f32 %v2418_v19, %v2735_v24  ;;  %v3054_v45 = vld [vmem:[#allocation2 + $0xa9] sm:$0xff] }
 0x13d   : > { %v1229_v61 = vadd.f32 %v1227_v44, %v1223_v0  ;;  %v1278_v18 = vadd.f32 %v1276_v60, %v1272_v10  ;;  %v1295_v48 = vmul.f32 %v3018_v63, %v2462_v43  ;;  %v1271_v54 = vmul.f32 %v2986_v49, %v2441_v31 }
 0x13e   : > { %2042 = vmatmul.mubr.f32.gmra.mrb[4].mxu1 %v1178_v3  ;;  %v1236_v5 = vadd.f32 %v2689_v33, %v1234_v42  ;;  %v1267_v62 = vadd.f32 %v1265_v35, %v1261_v25  ;;  %v1309_v57 = vmul.f32 %v2410_v13, %v2696_v37  ;;  %v1315_v56 = vmul.f32 %v2962_v9, %v2424_v22 }
 0x13f   : > { %v1235_v30 = vadd.f32 %v1233_v20, %v1229_v61  ;;  %v1285_v17 = vadd.f32 %v1283_v59, %v1278_v18  ;;  %v1277_v8 = vmul.f32 %v3001_v12, %v2456_v39  ;;  %v1284_v44 = vmul.f32 %v2426_v23, %v2764_v53 }
 0x140   : > { %v1238_v51 = vmax.f32 %v1236_v5, 0.0  ;;  %v1273_v21 = vadd.f32 %v1271_v54, %v1267_v62  ;;  %v1317_v50 = vadd.f32 %v1315_v56, %v1309_v57  ;;  %v1321_v38 = vmul.f32 %v2978_v36, %v2430_v26 }
 0x141   : > { %v1237_v41 = vadd.f32 %v2689_v33, %v1235_v30  ;;  %v1291_v37 = vadd.f32 %v1289_v47, %v1285_v17  ;;  %v1290_v9 = vmul.f32 %v3033_v7, %v2458_v40  ;;  %v1296_v55 = vmul.f32 %v3035_v6, %v2462_v43 }
 0x142   : > { %v1240_v28 = vmin.f32 %v1238_v51, 6.0  ;;  %v1279_v52 = vadd.f32 %v1277_v8, %v1273_v21  ;;  %v1323_v58 = vadd.f32 %v1321_v38, %v1317_v50  ;;  %v1327_v20 = vmul.f32 %v2418_v19, %v2772_v1 }
 0x143   : > { %v1239_v4 = vmax.f32 %v1237_v41, 0.0  ;;  %v1297_v60 = vadd.f32 %v1295_v48, %v1291_v37  ;;  %v1310_v36 = vmul.f32 %v2410_v13, %v2735_v24  ;;  %v1316_v32 = vmul.f32 %v2986_v49, %v2424_v22 }
 0x144   : > { %2044 = vmatprep.mubr.f32.mxu1 %v1240_v28  ;;  %v1286_v27 = vadd.f32 %v1284_v44, %v1279_v52  ;;  %v1329_v11 = vadd.f32 %v1327_v20, %v1323_v58  ;;  %v1333_v0 = vmul.f32 %v3008_v15, %v2441_v31  ;;  %v1339_v10 = vmul.f32 %v3018_v63, %v2456_v39 }
 0x145   : > { %v1241_v59 = vmin.f32 %v1239_v4, 6.0  ;;  %v1299_v47 = vadd.f32 %v2689_v33, %v1297_v60  ;;  %v1318_v3 = vadd.f32 %v1316_v32, %v1310_v36  ;;  %v1322_v42 = vmul.f32 %v3001_v12, %v2430_v26  ;;  %v1356_v12 = vld [vmem:[#allocation2 + $0xaa] sm:$0xff] }
 0x146   : > { %v1292_v24 = vadd.f32 %v1290_v9, %v1286_v27  ;;  %v1335_v25 = vadd.f32 %v1333_v0, %v1329_v11  ;;  %v1346_v49 = vmul.f32 %v2426_v23, %v2802_v29  ;;  %v1352_v35 = vmul.f32 %v3054_v45, %v2458_v40  ;;  %v1413_v11 = vld [vmem:[#allocation2 + $0xc1] sm:$0xff] }
 0x147   : > { %2045 = vmatmul.mubr.f32.gmra.mrb[6].mxu1 %v1241_v59  ;;  %v1301_v61 = vmax.f32 %v1299_v47, 0.0  ;;  %v1324_v18 = vadd.f32 %v1322_v42, %v1318_v3  ;;  %v1328_v48 = vmul.f32 %v2418_v19, %v2764_v53  ;;  %v1334_v54 = vmul.f32 %v3033_v7, %v2441_v31 }
 0x148   : > { %v1298_v5 = vadd.f32 %v1296_v55, %v1292_v24  ;;  %v1341_v62 = vadd.f32 %v1339_v10, %v1335_v25  ;;  %v1372_v57 = vmul.f32 %v2410_v13, %v2772_v1  ;;  %v1378_v56 = vmul.f32 %v3008_v15, %v2424_v22  ;;  %v1351_v1 = vld [vmem:[#allocation2 + $0xb1] sm:$0xff]  ;;  %v1419_v24 = vld [vmem:[#allocation2 + $0xc2] sm:$0xff] }
 0x149   : > { %v1303_v30 = vmin.f32 %v1301_v61, 6.0  ;;  %v1330_v17 = vadd.f32 %v1328_v48, %v1324_v18  ;;  %v1384_v21 = vmul.f32 %v3018_v63, %v2430_v26  ;;  %v1358_v50 = vmul.f32 %v1356_v12, %v2462_v43  ;;  %v1357_v55 = vld [vmem:[#allocation2 + $0xb2] sm:$0xff] }
 0x14a   : > { %v1300_v8 = vadd.f32 %v2689_v33, %v1298_v5  ;;  %v1348_v44 = vadd.f32 %v1346_v49, %v1341_v62  ;;  %v1380_v51 = vadd.f32 %v1378_v56, %v1372_v57  ;;  %v1340_v41 = vmul.f32 %v3035_v6, %v2456_v39 }
 0x14b   : > { %2047 = vmatprep.mubr.f32.mxu1 %v1303_v30  ;;  %v1336_v38 = vadd.f32 %v1334_v54, %v1330_v17  ;;  %v1390_v15 = vmul.f32 %v2418_v19, %v2802_v29  ;;  %v1396_v52 = vmul.f32 %v3054_v45, %v2441_v31  ;;  %v1347_v63 = vmul.f32 %v2426_v23, %v2839_v14  ;;  %v1414_v30 = vld [vmem:[#allocation2 + $0xc9] sm:$0xff] }
 0x14c   : > { %v1302_v37 = vmax.f32 %v1300_v8, 0.0  ;;  %v1354_v9 = vadd.f32 %v1352_v35, %v1348_v44  ;;  %v1386_v28 = vadd.f32 %v1384_v21, %v1380_v51  ;;  %v1373_v20 = vmul.f32 %v2410_v13, %v2764_v53 }
 0x14d   : > { %v1342_v58 = vadd.f32 %v1340_v41, %v1336_v38  ;;  %v1379_v4 = vmul.f32 %v3033_v7, %v2424_v22  ;;  %v1353_v32 = vmul.f32 %v1351_v1, %v2458_v40  ;;  %v1359_v10 = vmul.f32 %v1357_v55, %v2462_v43 }
 0x14e   : > { %v1304_v60 = vmin.f32 %v1302_v37, 6.0  ;;  %v1360_v36 = vadd.f32 %v1358_v50, %v1354_v9  ;;  %v1392_v27 = vadd.f32 %v1390_v15, %v1386_v28  ;;  %v1385_v47 = vmul.f32 %v3035_v6, %v2430_v26 }
 0x14f   : > { %v1349_v0 = vadd.f32 %v1347_v63, %v1342_v58  ;;  %v1381_v59 = vadd.f32 %v1379_v4, %v1373_v20  ;;  %v1402_v42 = vmul.f32 %v1356_v12, %v2456_v39  ;;  %v1409_v7 = vmul.f32 %v2426_v23, %v2877_v34 }
 0x150   : > { %2048 = vmatmul.mubr.f32.gmra.mrb[8].mxu1 %v1304_v60  ;;  %v1362_v3 = vadd.f32 %v2689_v33, %v1360_v36  ;;  %v1398_v53 = vadd.f32 %v1396_v52, %v1392_v27  ;;  %v1415_v49 = vmul.f32 %v1413_v11, %v2458_v40  ;;  %v1391_v61 = vmul.f32 %v2418_v19, %v2839_v14  ;;  %v1420_v52 = vld [vmem:[#allocation2 + $0xca] sm:$0xff] }
 0x151   : > { %v1355_v25 = vadd.f32 %v1353_v32, %v1349_v0  ;;  %v1387_v35 = vadd.f32 %v1385_v47, %v1381_v59  ;;  %v1435_v6 = vmul.f32 %v2410_v13, %v2802_v29  ;;  %v1441_v54 = vmul.f32 %v3054_v45, %v2424_v22  ;;  %v1476_v32 = vld [vmem:[#allocation2 + $0xd9] sm:$0xff] }
 0x152   : > { %v1364_v18 = vmax.f32 %v1362_v3, 0.0  ;;  %v1404_v48 = vadd.f32 %v1402_v42, %v1398_v53  ;;  %v1421_v62 = vmul.f32 %v1419_v24, %v2462_v43  ;;  %v1397_v56 = vmul.f32 %v1351_v1, %v2441_v31  ;;  %v1482_v42 = vld [vmem:[#allocation2 + $0xda] sm:$0xff] }
 0x153   : > { %v1361_v5 = vadd.f32 %v1359_v10, %v1355_v25  ;;  %v1393_v57 = vadd.f32 %v1391_v61, %v1387_v35  ;;  %v1443_v44 = vadd.f32 %v1441_v54, %v1435_v6  ;;  %v1447_v51 = vmul.f32 %v1356_v12, %v2430_v26  ;;  %v1483_v54 = vld [vmem:[#allocation2 + $0xe2] sm:$0xff] }
 0x154   : > { %v1366_v17 = vmin.f32 %v1364_v18, 6.0  ;;  %v1411_v8 = vadd.f32 %v1409_v7, %v1404_v48  ;;  %v1403_v29 = vmul.f32 %v1357_v55, %v2456_v39  ;;  %v1410_v45 = vmul.f32 %v2426_v23, %v2870_v46 }
 0x155   : > { %v1363_v21 = vadd.f32 %v2689_v33, %v1361_v5  ;;  %v1399_v50 = vadd.f32 %v1397_v56, %v1393_v57  ;;  %v1416_v41 = vmul.f32 %v1414_v30, %v2458_v40  ;;  %v1449_v15 = vadd.f32 %v1447_v51, %v1443_v44 }
 0x156   : > { %2050 = vmatprep.mubr.f32.mxu1 %v1366_v17  ;;  %v1417_v38 = vadd.f32 %v1415_v49, %v1411_v8  ;;  %v1453_v37 = vmul.f32 %v2418_v19, %v2877_v34  ;;  %v1436_v12 = vmul.f32 %v2410_v13, %v2839_v14  ;;  %v1442_v58 = vmul.f32 %v1351_v1, %v2424_v22 }
 0x157   : > { %v1365_v9 = vmax.f32 %v1363_v21, 0.0  ;;  %v1405_v28 = vadd.f32 %v1403_v29, %v1399_v50  ;;  %v1459_v4 = vmul.f32 %v1413_v11, %v2441_v31  ;;  %v1448_v0 = vmul.f32 %v1357_v55, %v2430_v26  ;;  %v1875_v29 = vld [vmem:[%s2254_s15 + $0x19] sm:$0xff] }
 0x158   : > { %v1423_v63 = vadd.f32 %v1421_v62, %v1417_v38  ;;  %v1455_v20 = vadd.f32 %v1453_v37, %v1449_v15  ;;  %v1444_v27 = vadd.f32 %v1442_v58, %v1436_v12  ;;  %v1422_v10 = vmul.f32 %v1420_v52, %v2462_v43  ;;  %v1878_v37 = vld [vmem:[%s2254_s15 + $0x39] sm:$0xff] }
 0x159   : > { %v1367_v60 = vmin.f32 %v1365_v9, 6.0  ;;  %v1412_v36 = vadd.f32 %v1410_v45, %v1405_v28  ;;  %v1465_v47 = vmul.f32 %v1419_v24, %v2456_v39  ;;  %v1454_v14 = vmul.f32 %v2418_v19, %v2870_v46  ;;  %v1477_v46 = vld [vmem:[#allocation2 + $0xe1] sm:$0xff] }
 0x15a   : > { %v1425_v34 = vadd.f32 %v2689_v33, %v1423_v63  ;;  %v1461_v59 = vadd.f32 %v1459_v4, %v1455_v20  ;;  %v1450_v22 = vadd.f32 %v1448_v0, %v1444_v27  ;;  %v1460_v1 = vmul.f32 %v1414_v30, %v2441_v31  ;;  %v1880_v4 = vld [vmem:[%s2254_s15 + $0x51] sm:$0xff] }
 0x15b   : > { %2051 = vmatmul.mubr.f32.gmra.mrb[10].mxu1 %v1367_v60  ;;  %v1418_v13 = vadd.f32 %v1416_v41, %v1412_v36  ;;  %v1472_v26 = vmul.f32 %v2426_v23, %v2905_v16  ;;  %v1478_v55 = vmul.f32 %v1476_v32, %v2458_v40  ;;  %v1466_v61 = vmul.f32 %v1420_v52, %v2456_v39  ;;  %v1877_v52 = vld [vmem:[%s2254_s15 + $0x31] sm:$0xff]  ;;  %v1879_v32 = vld [vmem:[%s2254_s15 + $0x49] sm:$0xff] }
 0x15c   : > { %v1427_v11 = vmax.f32 %v1425_v34, 0.0  ;;  %v1467_v3 = vadd.f32 %v1465_v47, %v1461_v59  ;;  %v1456_v7 = vadd.f32 %v1454_v14, %v1450_v22  ;;  %v1484_v31 = vmul.f32 %v1482_v42, %v2462_v43  ;;  %v1882_v59 = vld [vmem:[%s2254_s15 + $0x69] sm:$0xff]  ;;  %v1881_v22 = vld [vmem:[%s2254_s15 + $0x61] sm:$0xff]  ;;  %v1883_v42 = vld [vmem:[%s2254_s15 + $0x79] sm:$0xff] }
 0x15d   : > { %v1424_v53 = vadd.f32 %v1422_v10, %v1418_v13  ;;  %v1473_v16 = vmul.f32 %v2426_v23, %v2943_v2  ;;  %v1479_v57 = vmul.f32 %v1477_v46, %v2458_v40  ;;  %v1485_v30 = vmul.f32 %v1483_v54, %v2462_v43  ;;  %v3149_v40 = vld [vmem:[%s3241_s6] ss:$0 sm:$0xff] }
 0x15e   : > { %v1429_v25 = vmin.f32 %v1427_v11, 6.0  ;;  %v1474_v24 = vadd.f32 %v1472_v26, %v1467_v3  ;;  %v1462_v35 = vadd.f32 %v1460_v1, %v1456_v7  ;;  %v1884_v26 = vld [vmem:[%s2254_s15 + $0x81] sm:$0xff] }
 0x15f   : > { %v1426_v49 = vadd.f32 %v2689_v33, %v1424_v53 }
 0x160   : > { %2053 = vmatprep.mubr.f32.mxu1 %v1429_v25  ;;  %v1480_v19 = vadd.f32 %v1478_v55, %v1474_v24  ;;  %v1468_v48 = vadd.f32 %v1466_v61, %v1462_v35  ;;  %v1886_v35 = vld [vmem:[%s2254_s15 + $0x99] sm:$0xff] }
 0x161   : > { %v1428_v18 = vmax.f32 %v1426_v49, 0.0 }
 0x162   : > { %v1486_v6 = vadd.f32 %v1484_v31, %v1480_v19  ;;  %v1475_v62 = vadd.f32 %v1473_v16, %v1468_v48  ;;  %v1885_v31 = vld [vmem:[%s2254_s15 + $0x91] sm:$0xff] }
 0x163   : > { %v1430_v5 = vmin.f32 %v1428_v18, 6.0 }
 0x164   : > { %v1488_v39 = vadd.f32 %v2689_v33, %v1486_v6  ;;  %v1481_v56 = vadd.f32 %v1479_v57, %v1475_v62  ;;  %v1888_v6 = vld [vmem:[%s2254_s15 + $0xb1] sm:$0xff]  ;;  %v1887_v62 = vld [vmem:[%s2254_s15 + $0xa9] sm:$0xff] }
 0x165   : > { %2054 = vmatmul.mubr.f32.gmra.mrb[12].mxu1 %v1430_v5 }
 0x166   : > { %v1490_v17 = vmax.f32 %v1488_v39, 0.0  ;;  %v1487_v8 = vadd.f32 %v1485_v30, %v1481_v56 }
 0x168   : > { %v1492_v44 = vmin.f32 %v1490_v17, 6.0  ;;  %v1489_v23 = vadd.f32 %v2689_v33, %v1487_v8  ;;  %v1876_v33 = vld [vmem:[%s2254_s15 + $0x21] sm:$0xff]  ;;  %v1890_v17 = vld [vmem:[%s2254_s15 + $0xc9] sm:$0xff] }
 0x16a   : > { %2056 = vmatprep.mubr.f32.mxu1 %v1492_v44  ;;  %v1491_v2 = vmax.f32 %v1489_v23, 0.0  ;;  %v1889_v23 = vld [vmem:[%s2254_s15 + $0xc1] sm:$0xff] }
 0x16c   : > { %v1493_v51 = vmin.f32 %v1491_v2, 6.0 }
 0x16e   : > { %2057 = vmatmul.mubr.f32.gmra.mrb[14].mxu1 %v1493_v51 }
 0x1ec   : > { %v2037_v43 = vpop.f32.mrb[0].mxu1 }
 0x1ed   : > { %v1607_v21 = vadd.f32 %v2037_v43, %v3149_v40  ;;  %v1601_v50 = vpop.f32.mrb[1].mxu1 }
 0x1ee   : > { %v1602_v45 = vadd.f32 %v3149_v40, %v1601_v50 }
 0x1ef   : > { %v1700_v38 = vadd.f32 %v1876_v33, %v1607_v21 }
 0x1f0   : > { %v1699_v41 = vadd.f32 %v1875_v29, %v1602_v45 }
 0x1f1   : > { %1716 = vst.msk [vmem:[%s3157_s18 + $0x8] sm:$0xff] %vm345_vm1, %v1700_v38 }
 0x1f2   : > { %1715 = vst.msk [vmem:[%s3157_s18] sm:$0xff] %vm345_vm1, %v1699_v41 }
 0x201   : > { %v2040_v15 = vpop.f32.mrb[2].mxu1 }
 0x202   : > { %v1617_v9 = vadd.f32 %v2040_v15, %v3149_v40  ;;  %v1611_v28 = vpop.f32.mrb[3].mxu1 }
 0x203   : > { %v1612_v12 = vadd.f32 %v3149_v40, %v1611_v28 }
 0x204   : > { %v1702_v58 = vadd.f32 %v1878_v37, %v1617_v9 }
 0x205   : > { %v1701_v63 = vadd.f32 %v1877_v52, %v1612_v12 }
 0x206   : > { %1718 = vst.msk [vmem:[%s3157_s18 + $0x18] sm:$0xff] %vm345_vm1, %v1702_v58 }
 0x207   : > { %1717 = vst.msk [vmem:[%s3157_s18 + $0x10] sm:$0xff] %vm345_vm1, %v1701_v63 }
 0x211   : > { %v2043_v20 = vpop.f32.mrb[4].mxu1 }
 0x212   : > { %v1627_v60 = vadd.f32 %v2043_v20, %v3149_v40  ;;  %v1621_v36 = vpop.f32.mrb[5].mxu1 }
 0x213   : > { %v1622_v27 = vadd.f32 %v3149_v40, %v1621_v36 }
 0x214   : > { %v1704_v0 = vadd.f32 %v1880_v4, %v1627_v60 }
 0x215   : > { %v1703_v34 = vadd.f32 %v1879_v32, %v1622_v27 }
 0x216   : > { %1720 = vst.msk [vmem:[%s3157_s18 + $0x28] sm:$0xff] %vm345_vm1, %v1704_v0 }
 0x217   : > { %1719 = vst.msk [vmem:[%s3157_s18 + $0x20] sm:$0xff] %vm345_vm1, %v1703_v34 }
 0x21a   : > { %v2046_v10 = vpop.f32.mrb[6].mxu1 }
 0x21b   : > { %v1637_v47 = vadd.f32 %v2046_v10, %v3149_v40  ;;  %v1631_v13 = vpop.f32.mrb[7].mxu1 }
 0x21c   : > { %v1632_v14 = vadd.f32 %v3149_v40, %v1631_v13 }
 0x21d   : > { %v1706_v1 = vadd.f32 %v1882_v59, %v1637_v47 }
 0x21e   : > { %v1705_v11 = vadd.f32 %v1881_v22, %v1632_v14 }
 0x21f   : > { %1722 = vst.msk [vmem:[%s3157_s18 + $0x38] sm:$0xff] %vm345_vm1, %v1706_v1 }
 0x220   : > { %1721 = vst.msk [vmem:[%s3157_s18 + $0x30] sm:$0xff] %vm345_vm1, %v1705_v11 }
 0x223   : > { %v2049_v3 = vpop.f32.mrb[8].mxu1 }
 0x224   : > { %v1647_v55 = vadd.f32 %v2049_v3, %v3149_v40  ;;  %v1641_v53 = vpop.f32.mrb[9].mxu1 }
 0x225   : > { %v1642_v7 = vadd.f32 %v3149_v40, %v1641_v53 }
 0x226   : > { %v1708_v25 = vadd.f32 %v1884_v26, %v1647_v55 }
 0x227   : > { %v1707_v24 = vadd.f32 %v1883_v42, %v1642_v7 }
 0x228   : > { %1724 = vst.msk [vmem:[%s3157_s18 + $0x48] sm:$0xff] %vm345_vm1, %v1708_v25 }
 0x229   : > { %1723 = vst.msk [vmem:[%s3157_s18 + $0x40] sm:$0xff] %vm345_vm1, %v1707_v24 }
 0x22e   : > { %v2052_v49 = vpop.f32.mrb[10].mxu1 }
 0x22f   : > { %v1657_v61 = vadd.f32 %v2052_v49, %v3149_v40  ;;  %v1651_v19 = vpop.f32.mrb[11].mxu1 }
 0x230   : > { %v1652_v46 = vadd.f32 %v3149_v40, %v1651_v19 }
 0x231   : > { %v1710_v18 = vadd.f32 %v1886_v35, %v1657_v61 }
 0x232   : > { %v1709_v48 = vadd.f32 %v1885_v31, %v1652_v46 }
 0x233   : > { %1726 = vst.msk [vmem:[%s3157_s18 + $0x58] sm:$0xff] %vm345_vm1, %v1710_v18 }
 0x234   : > { %1725 = vst.msk [vmem:[%s3157_s18 + $0x50] sm:$0xff] %vm345_vm1, %v1709_v48 }
 0x238   : > { %v2055_v16 = vpop.f32.mrb[12].mxu1 }
 0x239   : > { %v1667_v54 = vadd.f32 %v2055_v16, %v3149_v40  ;;  %v1661_v5 = vpop.f32.mrb[13].mxu1 }
 0x23a   : > { %v1662_v57 = vadd.f32 %v3149_v40, %v1661_v5 }
 0x23b   : > { %v1712_v39 = vadd.f32 %v1888_v6, %v1667_v54 }
 0x23c   : > { %v1711_v56 = vadd.f32 %v1887_v62, %v1662_v57 }
 0x23d   : > { %1728 = vst.msk [vmem:[%s3157_s18 + $0x68] sm:$0xff] %vm345_vm1, %v1712_v39 }
 0x23e   : > { %1727 = vst.msk [vmem:[%s3157_s18 + $0x60] sm:$0xff] %vm345_vm1, %v1711_v56 }
 0x241   : > { %v2058_v30 = vpop.f32.mrb[14].mxu1 }
 0x242   : > { %v1677_v8 = vadd.f32 %v2058_v30, %v3149_v40  ;;  %v1671_v44 = vpop.f32.mrb[15].mxu1 }
 0x243   : > { %v1672_v2 = vadd.f32 %v3149_v40, %v1671_v44 }
 0x244   : > { %v1714_v51 = vadd.f32 %v1890_v17, %v1677_v8 }
 0x245   : > { %v1713_v43 = vadd.f32 %v1889_v23, %v1672_v2 }
 0x246   : > { %1730 = vst.msk [vmem:[%s3157_s18 + $0x78] sm:$0xff] %vm345_vm1, %v1714_v51 }
 0x247   : > { %1729 = vst.msk [vmem:[%s3157_s18 + $0x70] sm:$0xff] %vm345_vm1, %v1713_v43 }
 0x248 PF: > { %s17_s28 = sadd.s32 1, %s2170_s28   ;;  %s3303_s24 = smov %s2162_s26 }
 0x249   : > { %p14_p7 = scmp.ge.s32.totalorder %s17_s28, 6   ;;  %s3304_s25 = smov %s2166_s27 }
 0x24a   : > { %s3305_s26 = smov %s3308_s29  ;;  %s3306_s27 = smov %s3312_s30 }
 0x24b   :  { %16 = sbr.rel (!%p14_p7) target bundleno = 3 (0x3), region = 89 }

</bundles_post_ra>
